<compile_context>
chip_gen: v7x
topology: tpu7x:2x2x1
jax: 0.10.0
libtpu: 0.0.40
codegen_flags: <defaults>
</compile_context>

<pallas_src>
import functools
import math

import jax
import jax.numpy as jnp
from jax.experimental import pallas as pl
from jax.experimental.pallas import tpu as pltpu


def regular_lstm_kernel(x_ref, wproj_ref, bproj_ref, wrec_ref,
                        wl1_hbm, bl1_ref, wl2_hbm, bl2_ref,
                        out_ref,
                        xp_ref, wl1_buf, wl2_buf, dma_sem,
                        *, seq_len, batch, hidden_size):
    H = hidden_size
    T = seq_len
    B = batch

    # ---- 1) kick off the FC-weight DMAs so they overlap the serial recurrence ----
    cp1 = pltpu.make_async_copy(wl1_hbm, wl1_buf, dma_sem.at[0])
    cp2 = pltpu.make_async_copy(wl2_hbm, wl2_buf, dma_sem.at[1])
    cp1.start()
    cp2.start()

    # ---- 2) hoisted layer-0 input projection (off the critical path) ----
    # xp layout per row block t: layer-0 gate cols = x[t] @ wih0 + b0, layer-1 cols = b1.
    xp_ref[...] = (jnp.dot(x_ref[...], wproj_ref[...],
                           preferred_element_type=jnp.float32)
                   + bproj_ref[...])

    def cell2(g, c01):
        """Update BOTH LSTM cells at once from fused gates.

        g:   (B, 8H) in column blocks [i0,i1 | f0,f1 | o0,o1 | g0,g1]
        c01: (B, 2H) = [c_layer0 | c_layer1]
        returns (h01_new, c01_new), each (B, 2H) = [layer0 | layer1].
        """
        s = jax.nn.sigmoid(g[:, :6 * H])
        i01 = s[:, 0:2 * H]
        f01 = s[:, 2 * H:4 * H]
        o01 = s[:, 4 * H:6 * H]
        g01 = jnp.tanh(g[:, 6 * H:])
        c_new = f01 * c01 + i01 * g01
        return o01 * jnp.tanh(c_new), c_new

    # ---- 3) prologue: layer-0 cell at t=0 (zero init states => recurrent term is 0) ----
    # The layer-1 half of this update is masked back to zero to preserve h1/c1 init.
    lane = jax.lax.broadcasted_iota(jnp.int32, (1, 2 * H), 1)
    layer0_mask = (lane < H).astype(jnp.float32)
    hc, c01 = cell2(xp_ref[0:B, :], jnp.zeros((B, 2 * H), jnp.float32))
    hc = hc * layer0_mask          # hc  = [h0[0] | 0]
    c01 = c01 * layer0_mask        # c01 = [c0[0] | 0]

    # ---- 4) skewed recurrence: one fused matmul per timestep on the serial chain ----
    # Iteration t consumes hc = [h0[t] | h1[t-1]] and produces [h0[t+1] | h1[t]].
    # T=8 is small & static: full unroll is fine.
    # TODO(synk): switch to lax.fori_loop with (hc, c01) carry if seq_len grows beyond ~32.
    for t in range(T):
        idx = t + 1 if t + 1 < T else T - 1   # last iter: layer-0 half is unused garbage
        r = jnp.dot(hc, wrec_ref[...], preferred_element_type=jnp.float32)
        g = r + xp_ref[idx * B:(idx + 1) * B, :]
        hc, c01 = cell2(g, c01)

    # lstm_out[:, -1, :] == hidden state of the top layer at the last step
    last = hc[:, H:2 * H]

    # ---- 5) FC head: Linear -> Dropout(identity, eval) -> ReLU, twice ----
    cp1.wait()
    w1 = wl1_buf[...]
    y1 = (jnp.dot(last.astype(w1.dtype), w1, preferred_element_type=jnp.float32)
          + bl1_ref[...])
    y1 = jnp.maximum(y1, 0.0)

    cp2.wait()
    w2 = wl2_buf[...]
    y2 = (jnp.dot(y1.astype(w2.dtype), w2, preferred_element_type=jnp.float32)
          + bl2_ref[...])
    y2 = jnp.maximum(y2, 0.0)

    out_ref[...] = y2.astype(out_ref.dtype)


def regular_lstm_forward(x, params, *, hidden_size):
    B, T, F = x.shape
    H = hidden_size
    assert H % 8 == 0, "hidden_size must be a multiple of 8 for aligned gate slices"
    F_pad = params["w_proj"].shape[0]
    out_dim = params["wl2_t"].shape[1]

    # Pad batch to a multiple of 8 sublanes (unmasked loads/stores); pad features to a
    # multiple of 128 lanes so the in-kernel projection is lane-dense.
    B_pad = max(8, ((B + 7) // 8) * 8)
    x = jnp.pad(x, ((0, B_pad - B), (0, 0), (0, F_pad - F)))
    # Time-major, flattened: per-step reads are static leading-axis slices of (B, 8H) slabs.
    x_tm = jnp.transpose(x, (1, 0, 2)).reshape(T * B_pad, F_pad)

    kernel = functools.partial(regular_lstm_kernel,
                               seq_len=T, batch=B_pad, hidden_size=H)

    vmem = pl.BlockSpec(memory_space=pltpu.MemorySpace.VMEM)
    hbm = pl.BlockSpec(memory_space=pl.ANY)   # FC weights: manual DMA hidden behind recurrence

    out = pl.pallas_call(
        kernel,
        out_shape=jax.ShapeDtypeStruct((B_pad, out_dim), jnp.float32),
        in_specs=[vmem, vmem, vmem, vmem, hbm, vmem, hbm, vmem],
        out_specs=vmem,
        scratch_shapes=[
            pltpu.VMEM((T * B_pad, 8 * H), jnp.float32),                  # xp (hoisted proj)
            pltpu.VMEM(params["wl1_t"].shape, params["wl1_t"].dtype),      # FC1 weight buffer
            pltpu.VMEM(params["wl2_t"].shape, params["wl2_t"].dtype),      # FC2 weight buffer
            pltpu.SemaphoreType.DMA((2,)),
        ],
    )(x_tm,
      params["w_proj"], params["b_proj"], params["w_rec"],
      params["wl1_t"], params["bl1"], params["wl2_t"], params["bl2"])
    return out[:B]


# ----------------------------- parameter handling -----------------------------

def prepare_params(raw, hidden_size, num_input_features, *, fc_dtype=jnp.bfloat16):
    """Build kernel-layout params from PyTorch-layout raw params.

    Fused column layout (each block H wide): [i0,i1 | f0,f1 | o0,o1 | g0,g1]
      lane block 0 of every pair = LSTM layer 0, block 1 = layer 1.
    w_rec (2H, 8H): rows 0:H are multiplied by h0 (whh0 / wih1), rows H:2H by h1 (0 / whh1).
    w_proj (F_pad, 8H): layer-0 columns hold wih0, layer-1 columns are zero.
    b_proj (1, 8H): layer-0 columns hold b_ih0+b_hh0, layer-1 columns hold b_ih1+b_hh1.
    FC weights are pre-transposed and stored in `fc_dtype` (bf16 halves the hidden DMA).
    """
    H = hidden_size
    F = num_input_features
    F_pad = max(128, ((F + 127) // 128) * 128)

    def gate(m, name):  # m: (rows, 4H) in PyTorch gate order [i, f, g, o] along cols
        k = {"i": 0, "f": 1, "g": 2, "o": 3}[name]
        return m[:, k * H:(k + 1) * H]

    wih0_t = raw["wih0"].T.astype(jnp.float32)   # (F, 4H)
    whh0_t = raw["whh0"].T.astype(jnp.float32)   # (H, 4H)
    wih1_t = raw["wih1"].T.astype(jnp.float32)   # (H, 4H)
    whh1_t = raw["whh1"].T.astype(jnp.float32)   # (H, 4H)
    b0 = (raw["b_ih0"] + raw["b_hh0"]).reshape(1, 4 * H).astype(jnp.float32)
    b1 = (raw["b_ih1"] + raw["b_hh1"]).reshape(1, 4 * H).astype(jnp.float32)

    order = ("i", "f", "o", "g")    # sigmoid gates first (contiguous 6H), tanh gate last
    zH = jnp.zeros((H, H), jnp.float32)
    zF = jnp.zeros((F, H), jnp.float32)

    w_rec_top = jnp.concatenate(
        [blk for g in order for blk in (gate(whh0_t, g), gate(wih1_t, g))], axis=1)   # (H, 8H)
    w_rec_bot = jnp.concatenate(
        [blk for g in order for blk in (zH, gate(whh1_t, g))], axis=1)                # (H, 8H)
    w_rec = jnp.concatenate([w_rec_top, w_rec_bot], axis=0)                           # (2H, 8H)

    w_proj = jnp.concatenate(
        [blk for g in order for blk in (gate(wih0_t, g), zF)], axis=1)                # (F, 8H)
    w_proj = jnp.pad(w_proj, ((0, F_pad - F), (0, 0)))                                # (F_pad, 8H)

    b_proj = jnp.concatenate(
        [blk for g in order for blk in (gate(b0, g), gate(b1, g))], axis=1)           # (1, 8H)

    return {
        "w_proj": w_proj,
        "b_proj": b_proj,
        "w_rec": w_rec,                                         # recurrent path stays f32
        "wl1_t": raw["wl1"].T.astype(fc_dtype),                  # (H, 512)
        "bl1": raw["bl1"].reshape(1, -1).astype(jnp.float32),
        "wl2_t": raw["wl2"].T.astype(fc_dtype),                  # (512, 256)
        "bl2": raw["bl2"].reshape(1, -1).astype(jnp.float32),
    }


def init_raw_params(key, num_input_features, hidden_size, lin_layers=(512, 256)):
    """Deterministic PyTorch-style uniform init, PyTorch weight layout."""
    H = hidden_size
    keys = jax.random.split(key, 12)
    k_lstm = 1.0 / math.sqrt(H)

    def unif(k, shape, bound):
        return jax.random.uniform(k, shape, jnp.float32, -bound, bound)

    raw = {
        "wih0": unif(keys[0], (4 * H, num_input_features), k_lstm),
        "whh0": unif(keys[1], (4 * H, H), k_lstm),
        "b_ih0": unif(keys[2], (4 * H,), k_lstm),
        "b_hh0": unif(keys[3], (4 * H,), k_lstm),
        "wih1": unif(keys[4], (4 * H, H), k_lstm),
        "whh1": unif(keys[5], (4 * H, H), k_lstm),
        "b_ih1": unif(keys[6], (4 * H,), k_lstm),
        "b_hh1": unif(keys[7], (4 * H,), k_lstm),
    }
    l1_in, l1_out = H, lin_layers[0]
    l2_in, l2_out = lin_layers[0], lin_layers[1]
    k1 = 1.0 / math.sqrt(l1_in)
    k2 = 1.0 / math.sqrt(l2_in)
    raw["wl1"] = unif(keys[8], (l1_out, l1_in), k1)
    raw["bl1"] = unif(keys[9], (l1_out,), k1)
    raw["wl2"] = unif(keys[10], (l2_out, l2_in), k2)
    raw["bl2"] = unif(keys[11], (l2_out,), k2)
    return raw


def reference_forward(x, raw, *, hidden_size):
    """Pure-JAX reference in original PyTorch layout / gate order (i, f, g, o)."""
    H = hidden_size
    B, T, F = x.shape

    def cell(inp, h, c, wih, whh, b_ih, b_hh):
        g = inp @ wih.T + h @ whh.T + b_ih + b_hh
        i = jax.nn.sigmoid(g[:, :H])
        f = jax.nn.sigmoid(g[:, H:2 * H])
        gg = jnp.tanh(g[:, 2 * H:3 * H])
        o = jax.nn.sigmoid(g[:, 3 * H:])
        c = f * c + i * gg
        return o * jnp.tanh(c), c

    h0 = jnp.zeros((B, H)); c0 = jnp.zeros((B, H))
    h1 = jnp.zeros((B, H)); c1 = jnp.zeros((B, H))
    for t in range(T):
        h0, c0 = cell(x[:, t, :], h0, c0, raw["wih0"], raw["whh0"], raw["b_ih0"], raw["b_hh0"])
        h1, c1 = cell(h0, h1, c1, raw["wih1"], raw["whh1"], raw["b_ih1"], raw["b_hh1"])
    y1 = jnp.maximum(h1 @ raw["wl1"].T + raw["bl1"], 0.0)
    return jnp.maximum(y1 @ raw["wl2"].T + raw["bl2"], 0.0)


if __name__ == "__main__":
    B, T, F, H = 4, 8, 4, 32
    key = jax.random.PRNGKey(0)
    kx, kp = jax.random.split(key)

    x = jax.random.normal(kx, (B, T, F), jnp.float32)
    raw = init_raw_params(kp, num_input_features=F, hidden_size=H)
    ref = reference_forward(x, raw, hidden_size=H)

    # Full-f32 path (tight correctness check).
    params_f32 = prepare_params(raw, H, F, fc_dtype=jnp.float32)
    out = jax.block_until_ready(regular_lstm_forward(x, params_f32, hidden_size=H))
    assert out.shape == (B, 256), out.shape
    assert jnp.allclose(out, ref, atol=2e-4, rtol=2e-4), "f32 kernel mismatch vs JAX reference"

    # bf16 FC-weight path (default): recurrence stays f32, only the two head matmuls
    # use bf16 operands with f32 accumulation -> modest precision loss.
    params_bf16 = prepare_params(raw, H, F, fc_dtype=jnp.bfloat16)
    out_bf16 = jax.block_until_ready(regular_lstm_forward(x, params_bf16, hidden_size=H))
    assert out_bf16.shape == (B, 256), out_bf16.shape
    assert jnp.allclose(out_bf16, ref, atol=5e-2, rtol=5e-2), "bf16-FC kernel mismatch vs JAX reference"

    print("KERNEL_OK")
</pallas_src>

<mosaic_0001>
module attributes {stable_mosaic.version = 11 : i64} {
  func.func @regular_lstm_kernel(%arg0: memref<64x128xf32, #tpu.memory_space<vmem>>, %arg1: memref<128x256xf32, #tpu.memory_space<vmem>>, %arg2: memref<1x256xf32, #tpu.memory_space<vmem>>, %arg3: memref<64x256xf32, #tpu.memory_space<vmem>>, %arg4: memref<32x512xf32, #tpu.memory_space<any>>, %arg5: memref<1x512xf32, #tpu.memory_space<vmem>>, %arg6: memref<512x256xf32, #tpu.memory_space<any>>, %arg7: memref<1x256xf32, #tpu.memory_space<vmem>>, %arg8: memref<8x256xf32, #tpu.memory_space<vmem>>, %arg9: memref<64x256xf32, #tpu.memory_space<vmem>>, %arg10: memref<32x512xf32, #tpu.memory_space<vmem>>, %arg11: memref<512x256xf32, #tpu.memory_space<vmem>>, %arg12: memref<2x!tpu.dma_semaphore, #tpu.memory_space<semaphore_mem>>) attributes {dimension_semantics = [], scalar_prefetch = 0 : i64, scratch_operands = 4 : i64, tpu.core_type = #tpu.core_type<tc>} {
    %c0_i32 = arith.constant 0 : i32
    %0 = tpu.memref_slice %arg12[%c0_i32] : memref<2x!tpu.dma_semaphore, #tpu.memory_space<semaphore_mem>> -> memref<1x!tpu.dma_semaphore, #tpu.memory_space<semaphore_mem>>
    %1 = tpu.memref_squeeze %0 : memref<1x!tpu.dma_semaphore, #tpu.memory_space<semaphore_mem>> -> memref<!tpu.dma_semaphore, #tpu.memory_space<semaphore_mem>>
    tpu.enqueue_dma source(%arg4 : memref<32x512xf32, #tpu.memory_space<any>>) target(%arg10 : memref<32x512xf32, #tpu.memory_space<vmem>>) target_semaphore(%1 : memref<!tpu.dma_semaphore, #tpu.memory_space<semaphore_mem>>)
    %c1_i32 = arith.constant 1 : i32
    %2 = tpu.memref_slice %arg12[%c1_i32] : memref<2x!tpu.dma_semaphore, #tpu.memory_space<semaphore_mem>> -> memref<1x!tpu.dma_semaphore, #tpu.memory_space<semaphore_mem>>
    %3 = tpu.memref_squeeze %2 : memref<1x!tpu.dma_semaphore, #tpu.memory_space<semaphore_mem>> -> memref<!tpu.dma_semaphore, #tpu.memory_space<semaphore_mem>>
    tpu.enqueue_dma source(%arg6 : memref<512x256xf32, #tpu.memory_space<any>>) target(%arg11 : memref<512x256xf32, #tpu.memory_space<vmem>>) target_semaphore(%3 : memref<!tpu.dma_semaphore, #tpu.memory_space<semaphore_mem>>)
    %c0 = arith.constant 0 : index
    %c0_0 = arith.constant 0 : index
    %4 = vector.load %arg0[%c0, %c0_0] : memref<64x128xf32, #tpu.memory_space<vmem>>, vector<64x128xf32>
    %c0_1 = arith.constant 0 : index
    %c0_2 = arith.constant 0 : index
    %5 = vector.load %arg1[%c0_1, %c0_2] : memref<128x256xf32, #tpu.memory_space<vmem>>, vector<128x256xf32>
    %cst = arith.constant dense<0.000000e+00> : vector<64x256xf32>
    %6 = tpu.matmul %4, %5, %cst {dimension_numbers = #tpu.dot_dimension_numbers<[1], [0], [0], [1], [0, 0, 1, 1], [], []>} : vector<64x128xf32>, vector<128x256xf32>, vector<64x256xf32> -> vector<64x256xf32>
    %c0_3 = arith.constant 0 : index
    %c0_4 = arith.constant 0 : index
    %7 = vector.load %arg2[%c0_3, %c0_4] : memref<1x256xf32, #tpu.memory_space<vmem>>, vector<1x256xf32>
    %8 = vector.broadcast %7 : vector<1x256xf32> to vector<64x256xf32>
    %9 = arith.addf %6, %8 : vector<64x256xf32>
    %c0_5 = arith.constant 0 : index
    %c0_6 = arith.constant 0 : index
    %10 = vector.load %arg9[%c0_5, %c0_6] : memref<64x256xf32, #tpu.memory_space<vmem>>, vector<64x256xf32>
    tpu.vector_store %arg9[%c0_5, %c0_6], %9 {strides = array<i32>} : memref<64x256xf32, #tpu.memory_space<vmem>>, vector<64x256xf32>,
    %11 = tpu.iota {dimensions = array<i32: 1>} : vector<1x64xi32>
    %c32_i32 = arith.constant 32 : i32
    %12 = vector.broadcast %c32_i32 : i32 to vector<1x64xi32>
    %13 = arith.cmpi slt, %11, %12 : vector<1x64xi32>
    %14 = arith.extui %13 : vector<1x64xi1> to vector<1x64xi32>
    %15 = arith.sitofp %14 : vector<1x64xi32> to vector<1x64xf32>
    %c0_7 = arith.constant 0 : index
    %c0_8 = arith.constant 0 : index
    %16 = vector.load %arg9[%c0_7, %c0_8] : memref<64x256xf32, #tpu.memory_space<vmem>>, vector<8x256xf32>
    %cst_9 = arith.constant 0.000000e+00 : f32
    %17 = vector.broadcast %cst_9 : f32 to vector<8x64xf32>
    %18 = vector.extract_strided_slice %16 {offsets = [0, 0], sizes = [8, 192], strides = [1, 1]} : vector<8x256xf32> to vector<8x192xf32>
    %19 = arith.negf %18 : vector<8x192xf32>
    %20 = math.exp %19 : vector<8x192xf32>
    %cst_10 = arith.constant 1.000000e+00 : f32
    %21 = vector.broadcast %cst_10 : f32 to vector<8x192xf32>
    %22 = arith.addf %21, %20 : vector<8x192xf32>
    %23 = arith.divf %21, %22 : vector<8x192xf32>
    %24 = vector.extract_strided_slice %23 {offsets = [0, 0], sizes = [8, 64], strides = [1, 1]} : vector<8x192xf32> to vector<8x64xf32>
    %25 = vector.extract_strided_slice %23 {offsets = [0, 64], sizes = [8, 64], strides = [1, 1]} : vector<8x192xf32> to vector<8x64xf32>
    %26 = vector.extract_strided_slice %23 {offsets = [0, 128], sizes = [8, 64], strides = [1, 1]} : vector<8x192xf32> to vector<8x64xf32>
    %27 = vector.extract_strided_slice %16 {offsets = [0, 192], sizes = [8, 64], strides = [1, 1]} : vector<8x256xf32> to vector<8x64xf32>
    %28 = math.tanh %27 : vector<8x64xf32>
    %29 = arith.mulf %25, %17 : vector<8x64xf32>
    %30 = arith.mulf %24, %28 : vector<8x64xf32>
    %31 = arith.addf %29, %30 : vector<8x64xf32>
    %32 = math.tanh %31 : vector<8x64xf32>
    %33 = arith.mulf %26, %32 : vector<8x64xf32>
    %34 = vector.broadcast %15 : vector<1x64xf32> to vector<8x64xf32>
    %35 = arith.mulf %33, %34 : vector<8x64xf32>
    %36 = vector.broadcast %15 : vector<1x64xf32> to vector<8x64xf32>
    %37 = arith.mulf %31, %36 : vector<8x64xf32>
    %c0_11 = arith.constant 0 : index
    %c0_12 = arith.constant 0 : index
    %38 = vector.load %arg3[%c0_11, %c0_12] : memref<64x256xf32, #tpu.memory_space<vmem>>, vector<64x256xf32>
    %cst_13 = arith.constant dense<0.000000e+00> : vector<8x256xf32>
    %39 = tpu.matmul %35, %38, %cst_13 {dimension_numbers = #tpu.dot_dimension_numbers<[1], [0], [0], [1], [0, 0, 1, 1], [], []>} : vector<8x64xf32>, vector<64x256xf32>, vector<8x256xf32> -> vector<8x256xf32>
    %c8 = arith.constant 8 : index
    %c0_14 = arith.constant 0 : index
    %40 = vector.load %arg9[%c8, %c0_14] : memref<64x256xf32, #tpu.memory_space<vmem>>, vector<8x256xf32>
    %41 = arith.addf %39, %40 : vector<8x256xf32>
    %42 = vector.extract_strided_slice %41 {offsets = [0, 0], sizes = [8, 192], strides = [1, 1]} : vector<8x256xf32> to vector<8x192xf32>
    %43 = arith.negf %42 : vector<8x192xf32>
    %44 = math.exp %43 : vector<8x192xf32>
    %cst_15 = arith.constant 1.000000e+00 : f32
    %45 = vector.broadcast %cst_15 : f32 to vector<8x192xf32>
    %46 = arith.addf %45, %44 : vector<8x192xf32>
    %47 = arith.divf %45, %46 : vector<8x192xf32>
    %48 = vector.extract_strided_slice %47 {offsets = [0, 0], sizes = [8, 64], strides = [1, 1]} : vector<8x192xf32> to vector<8x64xf32>
    %49 = vector.extract_strided_slice %47 {offsets = [0, 64], sizes = [8, 64], strides = [1, 1]} : vector<8x192xf32> to vector<8x64xf32>
    %50 = vector.extract_strided_slice %47 {offsets = [0, 128], sizes = [8, 64], strides = [1, 1]} : vector<8x192xf32> to vector<8x64xf32>
    %51 = vector.extract_strided_slice %41 {offsets = [0, 192], sizes = [8, 64], strides = [1, 1]} : vector<8x256xf32> to vector<8x64xf32>
    %52 = math.tanh %51 : vector<8x64xf32>
    %53 = arith.mulf %49, %37 : vector<8x64xf32>
    %54 = arith.mulf %48, %52 : vector<8x64xf32>
    %55 = arith.addf %53, %54 : vector<8x64xf32>
    %56 = math.tanh %55 : vector<8x64xf32>
    %57 = arith.mulf %50, %56 : vector<8x64xf32>
    %c0_16 = arith.constant 0 : index
    %c0_17 = arith.constant 0 : index
    %58 = vector.load %arg3[%c0_16, %c0_17] : memref<64x256xf32, #tpu.memory_space<vmem>>, vector<64x256xf32>
    %cst_18 = arith.constant dense<0.000000e+00> : vector<8x256xf32>
    %59 = tpu.matmul %57, %58, %cst_18 {dimension_numbers = #tpu.dot_dimension_numbers<[1], [0], [0], [1], [0, 0, 1, 1], [], []>} : vector<8x64xf32>, vector<64x256xf32>, vector<8x256xf32> -> vector<8x256xf32>
    %c16 = arith.constant 16 : index
    %c0_19 = arith.constant 0 : index
    %60 = vector.load %arg9[%c16, %c0_19] : memref<64x256xf32, #tpu.memory_space<vmem>>, vector<8x256xf32>
    %61 = arith.addf %59, %60 : vector<8x256xf32>
    %62 = vector.extract_strided_slice %61 {offsets = [0, 0], sizes = [8, 192], strides = [1, 1]} : vector<8x256xf32> to vector<8x192xf32>
    %63 = arith.negf %62 : vector<8x192xf32>
    %64 = math.exp %63 : vector<8x192xf32>
    %cst_20 = arith.constant 1.000000e+00 : f32
    %65 = vector.broadcast %cst_20 : f32 to vector<8x192xf32>
    %66 = arith.addf %65, %64 : vector<8x192xf32>
    %67 = arith.divf %65, %66 : vector<8x192xf32>
    %68 = vector.extract_strided_slice %67 {offsets = [0, 0], sizes = [8, 64], strides = [1, 1]} : vector<8x192xf32> to vector<8x64xf32>
    %69 = vector.extract_strided_slice %67 {offsets = [0, 64], sizes = [8, 64], strides = [1, 1]} : vector<8x192xf32> to vector<8x64xf32>
    %70 = vector.extract_strided_slice %67 {offsets = [0, 128], sizes = [8, 64], strides = [1, 1]} : vector<8x192xf32> to vector<8x64xf32>
    %71 = vector.extract_strided_slice %61 {offsets = [0, 192], sizes = [8, 64], strides = [1, 1]} : vector<8x256xf32> to vector<8x64xf32>
    %72 = math.tanh %71 : vector<8x64xf32>
    %73 = arith.mulf %69, %55 : vector<8x64xf32>
    %74 = arith.mulf %68, %72 : vector<8x64xf32>
    %75 = arith.addf %73, %74 : vector<8x64xf32>
    %76 = math.tanh %75 : vector<8x64xf32>
    %77 = arith.mulf %70, %76 : vector<8x64xf32>
    %c0_21 = arith.constant 0 : index
    %c0_22 = arith.constant 0 : index
    %78 = vector.load %arg3[%c0_21, %c0_22] : memref<64x256xf32, #tpu.memory_space<vmem>>, vector<64x256xf32>
    %cst_23 = arith.constant dense<0.000000e+00> : vector<8x256xf32>
    %79 = tpu.matmul %77, %78, %cst_23 {dimension_numbers = #tpu.dot_dimension_numbers<[1], [0], [0], [1], [0, 0, 1, 1], [], []>} : vector<8x64xf32>, vector<64x256xf32>, vector<8x256xf32> -> vector<8x256xf32>
    %c24 = arith.constant 24 : index
    %c0_24 = arith.constant 0 : index
    %80 = vector.load %arg9[%c24, %c0_24] : memref<64x256xf32, #tpu.memory_space<vmem>>, vector<8x256xf32>
    %81 = arith.addf %79, %80 : vector<8x256xf32>
    %82 = vector.extract_strided_slice %81 {offsets = [0, 0], sizes = [8, 192], strides = [1, 1]} : vector<8x256xf32> to vector<8x192xf32>
    %83 = arith.negf %82 : vector<8x192xf32>
    %84 = math.exp %83 : vector<8x192xf32>
    %cst_25 = arith.constant 1.000000e+00 : f32
    %85 = vector.broadcast %cst_25 : f32 to vector<8x192xf32>
    %86 = arith.addf %85, %84 : vector<8x192xf32>
    %87 = arith.divf %85, %86 : vector<8x192xf32>
    %88 = vector.extract_strided_slice %87 {offsets = [0, 0], sizes = [8, 64], strides = [1, 1]} : vector<8x192xf32> to vector<8x64xf32>
    %89 = vector.extract_strided_slice %87 {offsets = [0, 64], sizes = [8, 64], strides = [1, 1]} : vector<8x192xf32> to vector<8x64xf32>
    %90 = vector.extract_strided_slice %87 {offsets = [0, 128], sizes = [8, 64], strides = [1, 1]} : vector<8x192xf32> to vector<8x64xf32>
    %91 = vector.extract_strided_slice %81 {offsets = [0, 192], sizes = [8, 64], strides = [1, 1]} : vector<8x256xf32> to vector<8x64xf32>
    %92 = math.tanh %91 : vector<8x64xf32>
    %93 = arith.mulf %89, %75 : vector<8x64xf32>
    %94 = arith.mulf %88, %92 : vector<8x64xf32>
    %95 = arith.addf %93, %94 : vector<8x64xf32>
    %96 = math.tanh %95 : vector<8x64xf32>
    %97 = arith.mulf %90, %96 : vector<8x64xf32>
    %c0_26 = arith.constant 0 : index
    %c0_27 = arith.constant 0 : index
    %98 = vector.load %arg3[%c0_26, %c0_27] : memref<64x256xf32, #tpu.memory_space<vmem>>, vector<64x256xf32>
    %cst_28 = arith.constant dense<0.000000e+00> : vector<8x256xf32>
    %99 = tpu.matmul %97, %98, %cst_28 {dimension_numbers = #tpu.dot_dimension_numbers<[1], [0], [0], [1], [0, 0, 1, 1], [], []>} : vector<8x64xf32>, vector<64x256xf32>, vector<8x256xf32> -> vector<8x256xf32>
    %c32 = arith.constant 32 : index
    %c0_29 = arith.constant 0 : index
    %100 = vector.load %arg9[%c32, %c0_29] : memref<64x256xf32, #tpu.memory_space<vmem>>, vector<8x256xf32>
    %101 = arith.addf %99, %100 : vector<8x256xf32>
    %102 = vector.extract_strided_slice %101 {offsets = [0, 0], sizes = [8, 192], strides = [1, 1]} : vector<8x256xf32> to vector<8x192xf32>
    %103 = arith.negf %102 : vector<8x192xf32>
    %104 = math.exp %103 : vector<8x192xf32>
    %cst_30 = arith.constant 1.000000e+00 : f32
    %105 = vector.broadcast %cst_30 : f32 to vector<8x192xf32>
    %106 = arith.addf %105, %104 : vector<8x192xf32>
    %107 = arith.divf %105, %106 : vector<8x192xf32>
    %108 = vector.extract_strided_slice %107 {offsets = [0, 0], sizes = [8, 64], strides = [1, 1]} : vector<8x192xf32> to vector<8x64xf32>
    %109 = vector.extract_strided_slice %107 {offsets = [0, 64], sizes = [8, 64], strides = [1, 1]} : vector<8x192xf32> to vector<8x64xf32>
    %110 = vector.extract_strided_slice %107 {offsets = [0, 128], sizes = [8, 64], strides = [1, 1]} : vector<8x192xf32> to vector<8x64xf32>
    %111 = vector.extract_strided_slice %101 {offsets = [0, 192], sizes = [8, 64], strides = [1, 1]} : vector<8x256xf32> to vector<8x64xf32>
    %112 = math.tanh %111 : vector<8x64xf32>
    %113 = arith.mulf %109, %95 : vector<8x64xf32>
    %114 = arith.mulf %108, %112 : vector<8x64xf32>
    %115 = arith.addf %113, %114 : vector<8x64xf32>
    %116 = math.tanh %115 : vector<8x64xf32>
    %117 = arith.mulf %110, %116 : vector<8x64xf32>
    %c0_31 = arith.constant 0 : index
    %c0_32 = arith.constant 0 : index
    %118 = vector.load %arg3[%c0_31, %c0_32] : memref<64x256xf32, #tpu.memory_space<vmem>>, vector<64x256xf32>
    %cst_33 = arith.constant dense<0.000000e+00> : vector<8x256xf32>
    %119 = tpu.matmul %117, %118, %cst_33 {dimension_numbers = #tpu.dot_dimension_numbers<[1], [0], [0], [1], [0, 0, 1, 1], [], []>} : vector<8x64xf32>, vector<64x256xf32>, vector<8x256xf32> -> vector<8x256xf32>
    %c40 = arith.constant 40 : index
    %c0_34 = arith.constant 0 : index
    %120 = vector.load %arg9[%c40, %c0_34] : memref<64x256xf32, #tpu.memory_space<vmem>>, vector<8x256xf32>
    %121 = arith.addf %119, %120 : vector<8x256xf32>
    %122 = vector.extract_strided_slice %121 {offsets = [0, 0], sizes = [8, 192], strides = [1, 1]} : vector<8x256xf32> to vector<8x192xf32>
    %123 = arith.negf %122 : vector<8x192xf32>
    %124 = math.exp %123 : vector<8x192xf32>
    %cst_35 = arith.constant 1.000000e+00 : f32
    %125 = vector.broadcast %cst_35 : f32 to vector<8x192xf32>
    %126 = arith.addf %125, %124 : vector<8x192xf32>
    %127 = arith.divf %125, %126 : vector<8x192xf32>
    %128 = vector.extract_strided_slice %127 {offsets = [0, 0], sizes = [8, 64], strides = [1, 1]} : vector<8x192xf32> to vector<8x64xf32>
    %129 = vector.extract_strided_slice %127 {offsets = [0, 64], sizes = [8, 64], strides = [1, 1]} : vector<8x192xf32> to vector<8x64xf32>
    %130 = vector.extract_strided_slice %127 {offsets = [0, 128], sizes = [8, 64], strides = [1, 1]} : vector<8x192xf32> to vector<8x64xf32>
    %131 = vector.extract_strided_slice %121 {offsets = [0, 192], sizes = [8, 64], strides = [1, 1]} : vector<8x256xf32> to vector<8x64xf32>
    %132 = math.tanh %131 : vector<8x64xf32>
    %133 = arith.mulf %129, %115 : vector<8x64xf32>
    %134 = arith.mulf %128, %132 : vector<8x64xf32>
    %135 = arith.addf %133, %134 : vector<8x64xf32>
    %136 = math.tanh %135 : vector<8x64xf32>
    %137 = arith.mulf %130, %136 : vector<8x64xf32>
    %c0_36 = arith.constant 0 : index
    %c0_37 = arith.constant 0 : index
    %138 = vector.load %arg3[%c0_36, %c0_37] : memref<64x256xf32, #tpu.memory_space<vmem>>, vector<64x256xf32>
    %cst_38 = arith.constant dense<0.000000e+00> : vector<8x256xf32>
    %139 = tpu.matmul %137, %138, %cst_38 {dimension_numbers = #tpu.dot_dimension_numbers<[1], [0], [0], [1], [0, 0, 1, 1], [], []>} : vector<8x64xf32>, vector<64x256xf32>, vector<8x256xf32> -> vector<8x256xf32>
    %c48 = arith.constant 48 : index
    %c0_39 = arith.constant 0 : index
    %140 = vector.load %arg9[%c48, %c0_39] : memref<64x256xf32, #tpu.memory_space<vmem>>, vector<8x256xf32>
    %141 = arith.addf %139, %140 : vector<8x256xf32>
    %142 = vector.extract_strided_slice %141 {offsets = [0, 0], sizes = [8, 192], strides = [1, 1]} : vector<8x256xf32> to vector<8x192xf32>
    %143 = arith.negf %142 : vector<8x192xf32>
    %144 = math.exp %143 : vector<8x192xf32>
    %cst_40 = arith.constant 1.000000e+00 : f32
    %145 = vector.broadcast %cst_40 : f32 to vector<8x192xf32>
    %146 = arith.addf %145, %144 : vector<8x192xf32>
    %147 = arith.divf %145, %146 : vector<8x192xf32>
    %148 = vector.extract_strided_slice %147 {offsets = [0, 0], sizes = [8, 64], strides = [1, 1]} : vector<8x192xf32> to vector<8x64xf32>
    %149 = vector.extract_strided_slice %147 {offsets = [0, 64], sizes = [8, 64], strides = [1, 1]} : vector<8x192xf32> to vector<8x64xf32>
    %150 = vector.extract_strided_slice %147 {offsets = [0, 128], sizes = [8, 64], strides = [1, 1]} : vector<8x192xf32> to vector<8x64xf32>
    %151 = vector.extract_strided_slice %141 {offsets = [0, 192], sizes = [8, 64], strides = [1, 1]} : vector<8x256xf32> to vector<8x64xf32>
    %152 = math.tanh %151 : vector<8x64xf32>
    %153 = arith.mulf %149, %135 : vector<8x64xf32>
    %154 = arith.mulf %148, %152 : vector<8x64xf32>
    %155 = arith.addf %153, %154 : vector<8x64xf32>
    %156 = math.tanh %155 : vector<8x64xf32>
    %157 = arith.mulf %150, %156 : vector<8x64xf32>
    %c0_41 = arith.constant 0 : index
    %c0_42 = arith.constant 0 : index
    %158 = vector.load %arg3[%c0_41, %c0_42] : memref<64x256xf32, #tpu.memory_space<vmem>>, vector<64x256xf32>
    %cst_43 = arith.constant dense<0.000000e+00> : vector<8x256xf32>
    %159 = tpu.matmul %157, %158, %cst_43 {dimension_numbers = #tpu.dot_dimension_numbers<[1], [0], [0], [1], [0, 0, 1, 1], [], []>} : vector<8x64xf32>, vector<64x256xf32>, vector<8x256xf32> -> vector<8x256xf32>
    %c56 = arith.constant 56 : index
    %c0_44 = arith.constant 0 : index
    %160 = vector.load %arg9[%c56, %c0_44] : memref<64x256xf32, #tpu.memory_space<vmem>>, vector<8x256xf32>
    %161 = arith.addf %159, %160 : vector<8x256xf32>
    %162 = vector.extract_strided_slice %161 {offsets = [0, 0], sizes = [8, 192], strides = [1, 1]} : vector<8x256xf32> to vector<8x192xf32>
    %163 = arith.negf %162 : vector<8x192xf32>
    %164 = math.exp %163 : vector<8x192xf32>
    %cst_45 = arith.constant 1.000000e+00 : f32
    %165 = vector.broadcast %cst_45 : f32 to vector<8x192xf32>
    %166 = arith.addf %165, %164 : vector<8x192xf32>
    %167 = arith.divf %165, %166 : vector<8x192xf32>
    %168 = vector.extract_strided_slice %167 {offsets = [0, 0], sizes = [8, 64], strides = [1, 1]} : vector<8x192xf32> to vector<8x64xf32>
    %169 = vector.extract_strided_slice %167 {offsets = [0, 64], sizes = [8, 64], strides = [1, 1]} : vector<8x192xf32> to vector<8x64xf32>
    %170 = vector.extract_strided_slice %167 {offsets = [0, 128], sizes = [8, 64], strides = [1, 1]} : vector<8x192xf32> to vector<8x64xf32>
    %171 = vector.extract_strided_slice %161 {offsets = [0, 192], sizes = [8, 64], strides = [1, 1]} : vector<8x256xf32> to vector<8x64xf32>
    %172 = math.tanh %171 : vector<8x64xf32>
    %173 = arith.mulf %169, %155 : vector<8x64xf32>
    %174 = arith.mulf %168, %172 : vector<8x64xf32>
    %175 = arith.addf %173, %174 : vector<8x64xf32>
    %176 = math.tanh %175 : vector<8x64xf32>
    %177 = arith.mulf %170, %176 : vector<8x64xf32>
    %c0_46 = arith.constant 0 : index
    %c0_47 = arith.constant 0 : index
    %178 = vector.load %arg3[%c0_46, %c0_47] : memref<64x256xf32, #tpu.memory_space<vmem>>, vector<64x256xf32>
    %cst_48 = arith.constant dense<0.000000e+00> : vector<8x256xf32>
    %179 = tpu.matmul %177, %178, %cst_48 {dimension_numbers = #tpu.dot_dimension_numbers<[1], [0], [0], [1], [0, 0, 1, 1], [], []>} : vector<8x64xf32>, vector<64x256xf32>, vector<8x256xf32> -> vector<8x256xf32>
    %c56_49 = arith.constant 56 : index
    %c0_50 = arith.constant 0 : index
    %180 = vector.load %arg9[%c56_49, %c0_50] : memref<64x256xf32, #tpu.memory_space<vmem>>, vector<8x256xf32>
    %181 = arith.addf %179, %180 : vector<8x256xf32>
    %182 = vector.extract_strided_slice %181 {offsets = [0, 0], sizes = [8, 192], strides = [1, 1]} : vector<8x256xf32> to vector<8x192xf32>
    %183 = arith.negf %182 : vector<8x192xf32>
    %184 = math.exp %183 : vector<8x192xf32>
    %cst_51 = arith.constant 1.000000e+00 : f32
    %185 = vector.broadcast %cst_51 : f32 to vector<8x192xf32>
    %186 = arith.addf %185, %184 : vector<8x192xf32>
    %187 = arith.divf %185, %186 : vector<8x192xf32>
    %188 = vector.extract_strided_slice %187 {offsets = [0, 0], sizes = [8, 64], strides = [1, 1]} : vector<8x192xf32> to vector<8x64xf32>
    %189 = vector.extract_strided_slice %187 {offsets = [0, 64], sizes = [8, 64], strides = [1, 1]} : vector<8x192xf32> to vector<8x64xf32>
    %190 = vector.extract_strided_slice %187 {offsets = [0, 128], sizes = [8, 64], strides = [1, 1]} : vector<8x192xf32> to vector<8x64xf32>
    %191 = vector.extract_strided_slice %181 {offsets = [0, 192], sizes = [8, 64], strides = [1, 1]} : vector<8x256xf32> to vector<8x64xf32>
    %192 = math.tanh %191 : vector<8x64xf32>
    %193 = arith.mulf %189, %175 : vector<8x64xf32>
    %194 = arith.mulf %188, %192 : vector<8x64xf32>
    %195 = arith.addf %193, %194 : vector<8x64xf32>
    %196 = math.tanh %195 : vector<8x64xf32>
    %197 = arith.mulf %190, %196 : vector<8x64xf32>
    %198 = vector.extract_strided_slice %197 {offsets = [0, 32], sizes = [8, 32], strides = [1, 1]} : vector<8x64xf32> to vector<8x32xf32>
    %c0_i32_52 = arith.constant 0 : i32
    %199 = tpu.memref_slice %arg12[%c0_i32_52] : memref<2x!tpu.dma_semaphore, #tpu.memory_space<semaphore_mem>> -> memref<1x!tpu.dma_semaphore, #tpu.memory_space<semaphore_mem>>
    %200 = tpu.memref_squeeze %199 : memref<1x!tpu.dma_semaphore, #tpu.memory_space<semaphore_mem>> -> memref<!tpu.dma_semaphore, #tpu.memory_space<semaphore_mem>>
    tpu.wait_dma2 semaphore(%200 : memref<!tpu.dma_semaphore, #tpu.memory_space<semaphore_mem>>) src(%arg4 : memref<32x512xf32, #tpu.memory_space<any>>) dst(%arg10 : memref<32x512xf32, #tpu.memory_space<vmem>>)
    %c0_53 = arith.constant 0 : index
    %c0_54 = arith.constant 0 : index
    %201 = vector.load %arg10[%c0_53, %c0_54] : memref<32x512xf32, #tpu.memory_space<vmem>>, vector<32x512xf32>
    %cst_55 = arith.constant dense<0.000000e+00> : vector<8x512xf32>
    %202 = tpu.matmul %198, %201, %cst_55 {dimension_numbers = #tpu.dot_dimension_numbers<[1], [0], [0], [1], [0, 0, 1, 1], [], []>} : vector<8x32xf32>, vector<32x512xf32>, vector<8x512xf32> -> vector<8x512xf32>
    %c0_56 = arith.constant 0 : index
    %c0_57 = arith.constant 0 : index
    %203 = vector.load %arg5[%c0_56, %c0_57] : memref<1x512xf32, #tpu.memory_space<vmem>>, vector<1x512xf32>
    %204 = vector.broadcast %203 : vector<1x512xf32> to vector<8x512xf32>
    %205 = arith.addf %202, %204 : vector<8x512xf32>
    %cst_58 = arith.constant 0.000000e+00 : f32
    %206 = vector.broadcast %cst_58 : f32 to vector<8x512xf32>
    %207 = arith.maximumf %205, %206 : vector<8x512xf32>
    %c1_i32_59 = arith.constant 1 : i32
    %208 = tpu.memref_slice %arg12[%c1_i32_59] : memref<2x!tpu.dma_semaphore, #tpu.memory_space<semaphore_mem>> -> memref<1x!tpu.dma_semaphore, #tpu.memory_space<semaphore_mem>>
    %209 = tpu.memref_squeeze %208 : memref<1x!tpu.dma_semaphore, #tpu.memory_space<semaphore_mem>> -> memref<!tpu.dma_semaphore, #tpu.memory_space<semaphore_mem>>
    tpu.wait_dma2 semaphore(%209 : memref<!tpu.dma_semaphore, #tpu.memory_space<semaphore_mem>>) src(%arg6 : memref<512x256xf32, #tpu.memory_space<any>>) dst(%arg11 : memref<512x256xf32, #tpu.memory_space<vmem>>)
    %c0_60 = arith.constant 0 : index
    %c0_61 = arith.constant 0 : index
    %210 = vector.load %arg11[%c0_60, %c0_61] : memref<512x256xf32, #tpu.memory_space<vmem>>, vector<512x256xf32>
    %cst_62 = arith.constant dense<0.000000e+00> : vector<8x256xf32>
    %211 = tpu.matmul %207, %210, %cst_62 {dimension_numbers = #tpu.dot_dimension_numbers<[1], [0], [0], [1], [0, 0, 1, 1], [], []>} : vector<8x512xf32>, vector<512x256xf32>, vector<8x256xf32> -> vector<8x256xf32>
    %c0_63 = arith.constant 0 : index
    %c0_64 = arith.constant 0 : index
    %212 = vector.load %arg7[%c0_63, %c0_64] : memref<1x256xf32, #tpu.memory_space<vmem>>, vector<1x256xf32>
    %213 = vector.broadcast %212 : vector<1x256xf32> to vector<8x256xf32>
    %214 = arith.addf %211, %213 : vector<8x256xf32>
    %cst_65 = arith.constant 0.000000e+00 : f32
    %215 = vector.broadcast %cst_65 : f32 to vector<8x256xf32>
    %216 = arith.maximumf %214, %215 : vector<8x256xf32>
    %c0_66 = arith.constant 0 : index
    %c0_67 = arith.constant 0 : index
    %217 = vector.load %arg8[%c0_66, %c0_67] : memref<8x256xf32, #tpu.memory_space<vmem>>, vector<8x256xf32>
    tpu.vector_store %arg8[%c0_66, %c0_67], %216 {strides = array<i32>} : memref<8x256xf32, #tpu.memory_space<vmem>>, vector<8x256xf32>,
    return
  }
}

</mosaic_0001>

<bundles_post_ra>
// kernel: tpu_custom_call.1
= control target key start
LH: loop header
LB: loop body
LE: loop exit
PB: predicated region body
PF: predicated region fallthrough
CT: control target
= control target key end

     0   :  { %13 = vsyncpa [#allocation7], 0  ;;  %s2665_s0 = inlined_call_operand.hbm [shape: f32[64,128], index: 0, kind: input, shape index: {}]   ;;  %s2666_s1 = inlined_call_operand.hbm [shape: f32[128,256], index: 1, kind: input, shape index: {}]   ;;  %s2667_s2 = inlined_call_operand.vmem [shape: f32[1,256], index: 2, kind: input, shape index: {}]   ;;  %s2668_s3 = inlined_call_operand.hbm [shape: f32[64,256], index: 3, kind: input, shape index: {}]   ;;  %s2669_s4 = inlined_call_operand.hbm [shape: f32[32,512], index: 4, kind: input, shape index: {}]   ;;  %s2670_s5 = inlined_call_operand.vmem [shape: f32[1,512], index: 5, kind: input, shape index: {}]   ;;  %s2671_s6 = inlined_call_operand.hbm [shape: f32[512,256], index: 6, kind: input, shape index: {}]   ;;  %s2672_s7 = inlined_call_operand.vmem [shape: f32[1,256], index: 7, kind: input, shape index: {}]   ;;  %s2673_s8 = inlined_call_operand.hbm [shape: f32[8,256], index: 8, kind: output, shape index: {}]  }
   0x1   :  { %14 = vsyncpa [#allocation10], 0 }
   0x2   :  { %15 = vsyncpa [#allocation8], 0  ;;  %s2316_s27 = smov [#allocation9]   ;;  %s2174_s9 = scalar_lea.hbm %s2666_s1, 4096 }
   0x3   :  { %s33_s28 = sshll.u32 %s2316_s27, 4  ;;  %p2175_p0 = scmp.ne.s32.totalorder %s2666_s1, %s2174_s9  ;;  %s34_s28 = int_to_ptr.vmem [resolvable:$true] %s33_s28 }
   0x4   :  { %p2178_p1 = scmp.lt.u32.totalorder %s2174_s9, %s2666_s1 }
   0x6   :  { %p2180_p2 = pnand %p2178_p1, %p2175_p0 }
   0x8   :  { %2183 = shalt.err (!%p2180_p2)
}
   0x9   :  { %s2184_s14 = scalar_lea.vmem %s34_s28, 4096  ;;  %p2189_p4 = scmp.lt.s32.totalorder %s34_s28, %s34_s28 }
   0xa   :  { %p2185_p3 = scmp.ne.s32.totalorder %s34_s28, %s2184_s14  ;;  %p2190_p5 = scmp.lt.s32.totalorder %s2184_s14, %s2184_s14 }
   0xc   :  { %p2191_p6 = por %p2190_p5, %p2189_p4 }
   0xe   :  { %p2192_p7 = pnand %p2191_p6, %p2185_p3 }
  0x10   :  { %2195 = shalt.err (!%p2192_p7)
}
  0x11   :  { %s2317_s15 = smov 256   ;;  %s2318_s16 = smov 16  }
  0x12   :  { %39 = dma.hbm_to_vmem [thread:$0]  %s2666_s1, 4096, %s34_s28, [#allocation10], %s2317_s15, %s2317_s15, %s2318_s16  }
  0x13   :  { %s2319_s19 = smov [#allocation6]   ;;  %s2196_s23 = scalar_lea.hbm %s2665_s0, 1024 }
  0x14   :  { %s21_s20 = sshll.u32 %s2319_s19, 4  ;;  %p2197_p8 = scmp.ne.s32.totalorder %s2665_s0, %s2196_s23  ;;  %s22_s20 = int_to_ptr.vmem [resolvable:$true] %s21_s20 }
  0x15   :  { %p2200_p9 = scmp.lt.u32.totalorder %s2196_s23, %s2665_s0 }
  0x17   :  { %p2202_p10 = pnand %p2200_p9, %p2197_p8 }
  0x19   :  { %2205 = shalt.err (!%p2202_p10)
}
  0x1a   :  { %s2206_s29 = scalar_lea.vmem %s22_s20, 1024  ;;  %p2211_p12 = scmp.lt.s32.totalorder %s22_s20, %s22_s20 }
  0x1b   :  { %p2207_p11 = scmp.ne.s32.totalorder %s22_s20, %s2206_s29  ;;  %p2212_p13 = scmp.lt.s32.totalorder %s2206_s29, %s2206_s29 }
  0x1d   :  { %p2213_p0 = por %p2212_p13, %p2211_p12 }
  0x1f   :  { %p2214_p1 = pnand %p2213_p0, %p2207_p11 }
  0x21   :  { %2217 = shalt.err (!%p2214_p1)
}
  0x22   :  { %s2320_s1 = smov 128   ;;  %s2321_s28 = smov 8  }
  0x23   :  { %27 = dma.hbm_to_vmem [thread:$0]  %s2665_s0, 1024, %s22_s20, [#allocation7], %s2320_s1, %s2320_s1, %s2321_s28  }
  0x24   :  { %s2322_s10 = smov [#allocation11]   ;;  %s2218_s14 = scalar_lea.hbm %s2668_s3, 2048 }
  0x25   :  { %s47_s11 = sshll.u32 %s2322_s10, 4  ;;  %p2219_p2 = scmp.ne.s32.totalorder %s2668_s3, %s2218_s14  ;;  %s48_s11 = int_to_ptr.vmem [resolvable:$true] %s47_s11 }
  0x26   :  { %p2222_p3 = scmp.lt.u32.totalorder %s2218_s14, %s2668_s3 }
  0x28   :  { %p2224_p4 = pnand %p2222_p3, %p2219_p2 }
  0x2a   :  { %2227 = shalt.err (!%p2224_p4)
}
  0x2b   :  { %s2228_s22 = scalar_lea.vmem %s48_s11, 2048  ;;  %p2233_p6 = scmp.lt.s32.totalorder %s48_s11, %s48_s11 }
  0x2c   :  { %p2229_p5 = scmp.ne.s32.totalorder %s48_s11, %s2228_s22  ;;  %p2234_p7 = scmp.lt.s32.totalorder %s2228_s22, %s2228_s22 }
  0x2e   :  { %p2235_p8 = por %p2234_p7, %p2233_p6 }
  0x30   :  { %p2236_p9 = pnand %p2235_p8, %p2229_p5 }
  0x32   :  { %2239 = shalt.err (!%p2236_p9)
}
  0x33   :  { %53 = dma.hbm_to_vmem [thread:$0]  %s2668_s3, 2048, %s48_s11, [#allocation10], %s2317_s15, %s2317_s15, %s2318_s16  }
  0x34   :  { %2306 = dma.done.wait [#allocation7], 1024  }
  0x35   :  { %2307 = vsyncadd [#allocation7], 4294966272 }
  0x36   :  { %2308 = dma.done.wait [#allocation10], 6144  }
  0x37   :  { %2309 = vsyncadd [#allocation10], 4294961152  ;;  %v2323_v0 = vmov 0.0   ;;  %v99_v1 = vld [vmem:[#allocation9 + $0x8] sm:$0xff]  ;;  %v101_v2 = vld [vmem:[#allocation9 + $0x18] sm:$0xff]  ;;  %v132_v50 = vlaneseq  ;;  %s2324_s16 = smov 64  }
  0x38   :  { %206 = vmatprep.mubr.f32.mxu0 %v2323_v0  ;;  %1140 = vmatprep.mubr.f32.mxu1 %v2323_v0  ;;  %v98_v3 = vld [vmem:[#allocation9] sm:$0xff]  ;;  %v1721_v4 = vpack.c.bf16 %v101_v2, %v99_v1  ;;  %v100_v5 = vld [vmem:[#allocation9 + $0x10] sm:$0xff]  ;;  %v103_v6 = vld [vmem:[#allocation9 + $0x28] sm:$0xff]  ;;  %vm332_vm1 = vcmask 523264   ;;  %s2326_s24 = smov [#allocation4]   ;;  %s2240_s29 = scalar_lea.hbm %s2669_s4, 2048 }
  0x39   :  { %v105_v7 = vld [vmem:[#allocation9 + $0x38] sm:$0xff]  ;;  %v1723_v8 = vpack.c.bf16 %v100_v5, %v98_v3  ;;  %v102_v10 = vld [vmem:[#allocation9 + $0x20] sm:$0xff]  ;;  %v104_v11 = vld [vmem:[#allocation9 + $0x30] sm:$0xff]  ;;  %v2419_v51 = vshrl.u32 %v132_v50, 7  ;;  %v272_v2 = vand.u32 127, %v132_v50  ;;  %s86_s25 = sshll.u32 %s2326_s24, 4  ;;  %p2241_p10 = scmp.ne.s32.totalorder %s2669_s4, %s2240_s29  ;;  %s87_s25 = int_to_ptr.vmem [resolvable:$true] %s86_s25 }
  0x3a   :  { %v1725_v9 = vpack.c.bf16 %v105_v7, %v103_v6  ;;  %v107_v12 = vld [vmem:[#allocation9 + $0x48] sm:$0xff]  ;;  %1722 = vmatprep.subr.bf16.mxu0 %v1721_v4  ;;  %v109_v13 = vld [vmem:[#allocation9 + $0x58] sm:$0xff]  ;;  %v1727_v14 = vpack.c.bf16 %v104_v11, %v102_v10  ;;  %v106_v16 = vld [vmem:[#allocation9 + $0x40] sm:$0xff]  ;;  %p2244_p11 = scmp.lt.u32.totalorder %s2240_s29, %s2669_s4 }
  0x3b   :  { %1724 = vmatpush1.bf16.msra.mxu0 %v1723_v8  ;;  %v1729_v15 = vpack.c.bf16 %v109_v13, %v107_v12  ;;  %v108_v17 = vld [vmem:[#allocation9 + $0x50] sm:$0xff]  ;;  %v111_v18 = vld [vmem:[#allocation9 + $0x68] sm:$0xff]  ;;  %v113_v19 = vld [vmem:[#allocation9 + $0x78] sm:$0xff]  ;;  %v2422_v52 = vsub.s32 1, %v2419_v51  ;;  %v2436_v59 = vsub.s32 0, %v2419_v51  ;;  %vm273_vm0 = vcmp.lt.s32.totalorder %v272_v2, 32 }
  0x3c   :  { %1726 = vmatprep.subr.bf16.mxu0 %v1725_v9  ;;  %v1731_v20 = vpack.c.bf16 %v108_v17, %v106_v16  ;;  %v1733_v21 = vpack.c.bf16 %v113_v19, %v111_v18  ;;  %v110_v22 = vld [vmem:[#allocation9 + $0x60] sm:$0xff]  ;;  %v112_v23 = vld [vmem:[#allocation9 + $0x70] sm:$0xff]  ;;  %v115_v24 = vld [vmem:[#allocation9 + $0x88] sm:$0xff]  ;;  %v2447_v9 = vsel %vm273_vm0, 1.0, %v2323_v0  ;;  %p2246_p12 = pnand %p2244_p11, %p2241_p10 }
  0x3d   :  { %v117_v25 = vld [vmem:[#allocation9 + $0x98] sm:$0xff]  ;;  %v1735_v26 = vpack.c.bf16 %v112_v23, %v110_v22  ;;  %v114_v28 = vld [vmem:[#allocation9 + $0x80] sm:$0xff]  ;;  %v116_v29 = vld [vmem:[#allocation9 + $0x90] sm:$0xff] }
  0x3e   :  { %v1737_v27 = vpack.c.bf16 %v117_v25, %v115_v24  ;;  %v119_v30 = vld [vmem:[#allocation9 + $0xa8] sm:$0xff]  ;;  %v121_v31 = vld [vmem:[#allocation9 + $0xb8] sm:$0xff]  ;;  %v1739_v32 = vpack.c.bf16 %v116_v29, %v114_v28  ;;  %v118_v34 = vld [vmem:[#allocation9 + $0xa0] sm:$0xff] }
  0x3f   :  { %1728 = vmatpush1.bf16.msra.mxu0 %v1727_v14  ;;  %v1741_v33 = vpack.c.bf16 %v121_v31, %v119_v30  ;;  %v120_v35 = vld [vmem:[#allocation9 + $0xb0] sm:$0xff]  ;;  %v123_v36 = vld [vmem:[#allocation9 + $0xc8] sm:$0xff]  ;;  %v125_v37 = vld [vmem:[#allocation9 + $0xd8] sm:$0xff] }
  0x40   :  { %1730 = vmatprep.subr.bf16.mxu0 %v1729_v15  ;;  %v1743_v38 = vpack.c.bf16 %v120_v35, %v118_v34  ;;  %v1745_v39 = vpack.c.bf16 %v125_v37, %v123_v36  ;;  %v122_v40 = vld [vmem:[#allocation9 + $0xc0] sm:$0xff]  ;;  %v124_v41 = vld [vmem:[#allocation9 + $0xd0] sm:$0xff]  ;;  %v127_v42 = vld [vmem:[#allocation9 + $0xe8] sm:$0xff] }
  0x41   :  { %v129_v43 = vld [vmem:[#allocation9 + $0xf8] sm:$0xff]  ;;  %v1747_v44 = vpack.c.bf16 %v124_v41, %v122_v40  ;;  %v126_v46 = vld [vmem:[#allocation9 + $0xe0] sm:$0xff]  ;;  %v128_v47 = vld [vmem:[#allocation9 + $0xf0] sm:$0xff] }
  0x42   :  { %v1749_v45 = vpack.c.bf16 %v129_v43, %v127_v42  ;;  %v1751_v48 = vpack.c.bf16 %v128_v47, %v126_v46  ;;  %v90_v49 = vld [vmem:[#allocation6] sm:$0xff]  ;;  %v315_v6 = vld [vmem:[#allocation11 + $0x8] sm:$0xff]  ;;  %v317_v7 = vld [vmem:[#allocation11 + $0x18] sm:$0xff] }
  0x43   :  { %1732 = vmatpush1.bf16.msra.mxu0 %v1731_v20  ;;  %v130_v53 = vld [vmem:[%s2667_s2] sm:$0x3]  ;;  %v2449_v10 = vpack.c.bf16 %v317_v7, %v315_v6  ;;  %v316_v11 = vld [vmem:[#allocation11 + $0x10] sm:$0xff]  ;;  %v91_v12 = vld [vmem:[#allocation6 + $0x8] sm:$0xff]  ;;  %s2325_s2 = smov [#allocation3]  }
  0x44   :  { %1734 = vmatprep.subr.bf16.mxu0 %v1733_v21  ;;  %v2428_v54 = vrot.slane %v130_v53, %v2422_v52  ;;  %v2439_v60 = vrot.slane %v130_v53, %v2436_v59  ;;  %v314_v8 = vld [vmem:[#allocation11] sm:$0xff]  ;;  %v319_v14 = vld [vmem:[#allocation11 + $0x28] sm:$0xff]  ;;  %v321_v15 = vld [vmem:[#allocation11 + $0x38] sm:$0xff]  ;;  %s74_s23 = sshll.u32 %s2325_s2, 4  ;;  %s75_s23 = int_to_ptr.vmem [resolvable:$true] %s74_s23 }
  0x45   :  { %v2451_v13 = vpack.c.bf16 %v316_v11, %v314_v8  ;;  %v318_v16 = vld [vmem:[#allocation11 + $0x20] sm:$0xff]  ;;  %v92_v17 = vld [vmem:[#allocation6 + $0x10] sm:$0xff]  ;;  %v2455_v18 = vpack.c.bf16 %v321_v15, %v319_v14  ;;  %v323_v21 = vld [vmem:[#allocation11 + $0x48] sm:$0xff]  ;;  %1866 = vmatprep.subr.bf16.mxu1 %v2449_v10 }
  0x46   :  { %v320_v19 = vld [vmem:[#allocation11 + $0x30] sm:$0xff]  ;;  %v325_v22 = vld [vmem:[#allocation11 + $0x58] sm:$0xff]  ;;  %v322_v24 = vld [vmem:[#allocation11 + $0x40] sm:$0xff] }
  0x47   :  { %1736 = vmatpush1.bf16.msra.mxu0 %v1735_v26  ;;  %v2460_v20 = vpack.c.bf16 %v320_v19, %v318_v16  ;;  %v2463_v23 = vpack.c.bf16 %v325_v22, %v323_v21  ;;  %v324_v25 = vld [vmem:[#allocation11 + $0x50] sm:$0xff]  ;;  %v327_v26 = vld [vmem:[#allocation11 + $0x68] sm:$0xff]  ;;  %1868 = vmatpush1.bf16.msra.mxu1 %v2451_v13  ;;  %v93_v28 = vld [vmem:[#allocation6 + $0x18] sm:$0xff] }
  0x48   :  { %1738 = vmatprep.subr.bf16.mxu0 %v1737_v27  ;;  %v329_v27 = vld [vmem:[#allocation11 + $0x78] sm:$0xff]  ;;  %1870 = vmatprep.subr.bf16.mxu1 %v2455_v18  ;;  %v2470_v29 = vpack.c.bf16 %v324_v25, %v322_v24  ;;  %v326_v31 = vld [vmem:[#allocation11 + $0x60] sm:$0xff]  ;;  %v95_v35 = vld [vmem:[#allocation6 + $0x28] sm:$0xff] }
  0x49   :  { %v2473_v30 = vpack.c.bf16 %v329_v27, %v327_v26  ;;  %v96_v36 = vld [vmem:[#allocation6 + $0x30] sm:$0xff]  ;;  %v97_v37 = vld [vmem:[#allocation6 + $0x38] sm:$0xff] }
  0x4b   :  { %1740 = vmatpush1.bf16.msra.mxu0 %v1739_v32  ;;  %v328_v32 = vld [vmem:[#allocation11 + $0x70] sm:$0xff]  ;;  %1872 = vmatpush1.bf16.msra.mxu1 %v2460_v20 }
  0x4c   :  { %1742 = vmatprep.subr.bf16.mxu0 %v1741_v33  ;;  %v94_v33 = vld [vmem:[#allocation6 + $0x20] sm:$0xff]  ;;  %1874 = vmatprep.subr.bf16.mxu1 %v2463_v23  ;;  %v2479_v34 = vpack.c.bf16 %v328_v32, %v326_v31 }
  0x4f   :  { %1744 = vmatpush1.bf16.msra.mxu0 %v1743_v38  ;;  %1876 = vmatpush1.bf16.msra.mxu1 %v2470_v29 }
  0x50   :  { %1746 = vmatprep.subr.bf16.mxu0 %v1745_v39  ;;  %1878 = vmatprep.subr.bf16.mxu1 %v2473_v30 }
  0x53   :  { %1748 = vmatpush1.bf16.msra.mxu0 %v1747_v44  ;;  %1880 = vmatpush1.bf16.msra.mxu1 %v2479_v34 }
  0x54   :  { %1750 = vmatprep.subr.bf16.mxu0 %v1749_v45 }
  0x57   :  { %1752 = vmatpush1.bf16.msra.mxu0 %v1751_v48 }
  0x58   :  { %1754 = vmatprep.subr.bf16.mxu0 %v2449_v10 }
  0x5a   :  { %207 = vmatmul.mubr.f32.vlgmr.msra.gmra.mrb[0].mxu0 %v90_v49 }
  0x5b   :  { %212 = vmatprep.mubr.f32.mxu0 %v2323_v0  ;;  %1756 = vmatpush1.bf16.msra.mxu0 %v2451_v13 }
  0x5c   :  { %1758 = vmatprep.subr.bf16.mxu0 %v2455_v18 }
  0x5e   :  { %213 = vmatmul.mubr.f32.gmra.mrb[2].mxu0 %v91_v12 }
  0x5f   :  { %218 = vmatprep.mubr.f32.mxu0 %v2323_v0  ;;  %1760 = vmatpush1.bf16.msra.mxu0 %v2460_v20 }
  0x60   :  { %1762 = vmatprep.subr.bf16.mxu0 %v2463_v23 }
  0x62   :  { %219 = vmatmul.mubr.f32.gmra.mrb[4].mxu0 %v92_v17 }
  0x63   :  { %224 = vmatprep.mubr.f32.mxu0 %v2323_v0  ;;  %1764 = vmatpush1.bf16.msra.mxu0 %v2470_v29 }
  0x64   :  { %1766 = vmatprep.subr.bf16.mxu0 %v2473_v30 }
  0x66   :  { %225 = vmatmul.mubr.f32.gmra.mrb[6].mxu0 %v93_v28 }
  0x67   :  { %230 = vmatprep.mubr.f32.mxu0 %v2323_v0  ;;  %1768 = vmatpush1.bf16.msra.mxu0 %v2479_v34 }
  0x68   :  { %1770 = vmatprep.subr.bf16.mxu0 %v2449_v10 }
  0x6a   :  { %231 = vmatmul.mubr.f32.gmra.mrb[8].mxu0 %v94_v33 }
  0x6b   :  { %236 = vmatprep.mubr.f32.mxu0 %v2323_v0 }
  0x6e   :  { %237 = vmatmul.mubr.f32.gmra.mrb[10].mxu0 %v95_v35 }
  0x6f   :  { %242 = vmatprep.mubr.f32.mxu0 %v2323_v0 }
  0x72   :  { %243 = vmatmul.mubr.f32.gmra.mrb[12].mxu0 %v96_v36 }
  0x73   :  { %248 = vmatprep.mubr.f32.mxu0 %v2323_v0 }
  0x76   :  { %249 = vmatmul.mubr.f32.gmra.mrb[14].mxu0 %v97_v37 }
  0x77   :  { %400 = vmatprep.mubr.f32.mxu0 %v2323_v0 }
 0x12d   :  { %v208_v55 = vpop.f32.mrb[0].mxu0 }
 0x12e   :  { %v210_v56 = vpop.f32.mrb[1].mxu0  ;;  %v209_v61 = vadd.f32 %v208_v55, %v2439_v60 }
 0x12f   :  { %v2431_v57 = vadd.f32 %v210_v56, %v2428_v54 }
 0x130   :  { %v1691_v62 = vmul.f32 -1.442695, %v209_v61 }
 0x131   :  { %2066 = vtanh.f32 %v2431_v57  ;;  %v1692_v42 = vmul.f32 -1.442695, %v2431_v57 }
 0x132   :  { %2068 = vpow2.f32 %v1691_v62 }
 0x13b   :  { %v2067_v58 = vpop.eup %2066 }
 0x13c   :  { %293 = vrot.lane.b32.xlu0 %v2067_v58, %s2324_s16  ;;  %v2069_v63 = vpop.eup %2068 }
 0x13d   :  { %v284_v1 = vadd.f32 1.0, %v2069_v63 }
 0x13f   :  { %2070 = vrcp.f32 %v284_v1 }
 0x149   :  { %v2442_v3 = vpop.eup %2070  ;;  %v2494_v45 = vpop.f32.mrb[14].mxu0 }
 0x14a   :  { %v291_v38 = vmul.f32 0.0, %v2442_v3  ;;  %v2496_v46 = vpop.f32.mrb[15].mxu0 }
 0x1ae   :  { %v294_v4 = vpop.permute.xlu0 %293 }
 0x1af   :  { %v296_v5 = vmul.f32 %v2442_v3, %v294_v4 }
 0x1b1   :  { %298 = vrot.lane.b32.xlu0 %v296_v5, %s2324_s16 }
 0x1b5   :  { %310 = vrot.lane.b32.xlu0 %v2447_v9, %s2324_s16 }
 0x223   :  { %v299_v39 = vpop.permute.xlu0 %298 }
 0x224   :  { %v301_v40 = vadd.f32 %v299_v39, %v291_v38 }
 0x226   :  { %2072 = vtanh.f32 %v301_v40 }
 0x227   :  { %2074 = vpow2.f32 %v1692_v42  ;;  %v311_v4 = vpop.permute.xlu0 %310 }
 0x228   :  { %v313_v5 = vmul.f32 %v311_v4, %v301_v40 }
 0x230   :  { %v2073_v41 = vpop.eup %2072 }
 0x231   :  { %304 = vrot.lane.b32.xlu1 %v2073_v41, %s2324_s16  ;;  %v2075_v43 = vpop.eup %2074 }
 0x232   :  { %v285_v44 = vadd.f32 1.0, %v2075_v43 }
 0x234   :  { %2076 = vrcp.f32 %v285_v44 }
 0x23e   :  { %v2077_v47 = vpop.eup %2076 }
 0x2a3   :  { %v305_v48 = vpop.permute.xlu1 %304 }
 0x2a4   :  { %v307_v49 = vmul.f32 %v2077_v47, %v305_v48 }
 0x2a6   :  { %v308_v50 = vmul.f32 %v2447_v9, %v307_v49 }
 0x2a8   :  { %1693 = vmatmul.mubr.msk.f32.vlgmr.msra.gmra.mrb[2].mxu0 %vm332_vm1, %v308_v50 }
 0x2a9   :  { %1772 = vmatpush1.bf16.msra.mxu0 %v2451_v13  ;;  %506 = vmatprep.mubr.f32.mxu0 %v2323_v0 }
 0x2aa   :  { %1774 = vmatprep.subr.bf16.mxu0 %v2455_v18 }
 0x2ad   :  { %1776 = vmatpush1.bf16.msra.mxu0 %v2460_v20 }
 0x2ae   :  { %1778 = vmatprep.subr.bf16.mxu0 %v2463_v23 }
 0x2b1   :  { %1780 = vmatpush1.bf16.msra.mxu0 %v2470_v29 }
 0x2b2   :  { %1782 = vmatprep.subr.bf16.mxu0 %v2473_v30 }
 0x2b5   :  { %1784 = vmatpush1.bf16.msra.mxu0 %v2479_v34 }
 0x2b6   :  { %1786 = vmatprep.subr.bf16.mxu0 %v2449_v10 }
 0x37b   :  { %v402_v53 = vpop.f32.mrb[2].mxu0 }
 0x37c   :  { %v404_v55 = vpop.f32.mrb[3].mxu0  ;;  %v2025_v58 = vadd.f32 %v402_v53, %v2439_v60 }
 0x37d   :  { %v2026_v56 = vadd.f32 %v404_v55, %v2428_v54 }
 0x37e   :  { %v1694_v61 = vmul.f32 -1.442695, %v2025_v58 }
 0x37f   :  { %2078 = vtanh.f32 %v2026_v56  ;;  %v1695_v11 = vmul.f32 -1.442695, %v2026_v56 }
 0x380   :  { %2080 = vpow2.f32 %v1694_v61 }
 0x389   :  { %v2079_v57 = vpop.eup %2078 }
 0x38a   :  { %422 = vrot.lane.b32.xlu1 %v2079_v57, %s2324_s16  ;;  %v2081_v62 = vpop.eup %2080 }
 0x38b   :  { %v413_v63 = vadd.f32 1.0, %v2081_v62 }
 0x38d   :  { %2082 = vrcp.f32 %v413_v63 }
 0x397   :  { %v2083_v1 = vpop.eup %2082 }
 0x398   :  { %v420_v6 = vmul.f32 %v2083_v1, %v313_v5 }
 0x3fc   :  { %v423_v2 = vpop.permute.xlu1 %422 }
 0x3fd   :  { %v425_v3 = vmul.f32 %v2083_v1, %v423_v2 }
 0x3ff   :  { %427 = vrot.lane.b32.xlu1 %v425_v3, %s2324_s16 }
 0x471   :  { %v428_v7 = vpop.permute.xlu1 %427 }
 0x472   :  { %v430_v8 = vadd.f32 %v428_v7, %v420_v6 }
 0x474   :  { %2084 = vtanh.f32 %v430_v8 }
 0x475   :  { %2086 = vpow2.f32 %v1695_v11 }
 0x47e   :  { %v2085_v9 = vpop.eup %2084 }
 0x47f   :  { %433 = vrot.lane.b32.xlu0 %v2085_v9, %s2324_s16  ;;  %v2087_v12 = vpop.eup %2086 }
 0x480   :  { %v414_v14 = vadd.f32 1.0, %v2087_v12 }
 0x482   :  { %2088 = vrcp.f32 %v414_v14 }
 0x48c   :  { %v2089_v15 = vpop.eup %2088 }
 0x4f1   :  { %v434_v16 = vpop.permute.xlu0 %433 }
 0x4f2   :  { %v436_v17 = vmul.f32 %v2089_v15, %v434_v16 }
 0x4f4   :  { %1696 = vmatmul.mubr.msk.f32.vlgmr.msra.gmra.mrb[4].mxu0 %vm332_vm1, %v436_v17 }
 0x4f5   :  { %1788 = vmatpush1.bf16.msra.mxu0 %v2451_v13  ;;  %612 = vmatprep.mubr.f32.mxu0 %v2323_v0 }
 0x4f6   :  { %1790 = vmatprep.subr.bf16.mxu0 %v2455_v18 }
 0x4f9   :  { %1792 = vmatpush1.bf16.msra.mxu0 %v2460_v20 }
 0x4fa   :  { %1794 = vmatprep.subr.bf16.mxu0 %v2463_v23 }
 0x4fd   :  { %1796 = vmatpush1.bf16.msra.mxu0 %v2470_v29 }
 0x4fe   :  { %1798 = vmatprep.subr.bf16.mxu0 %v2473_v30 }
 0x501   :  { %1800 = vmatpush1.bf16.msra.mxu0 %v2479_v34 }
 0x502   :  { %1802 = vmatprep.subr.bf16.mxu0 %v2449_v10 }
 0x5c7   :  { %v508_v19 = vpop.f32.mrb[4].mxu0 }
 0x5c8   :  { %v510_v21 = vpop.f32.mrb[5].mxu0  ;;  %v2027_v25 = vadd.f32 %v508_v19, %v2439_v60 }
 0x5c9   :  { %v2028_v22 = vadd.f32 %v510_v21, %v2428_v54 }
 0x5ca   :  { %v1697_v26 = vmul.f32 -1.442695, %v2027_v25 }
 0x5cb   :  { %2090 = vtanh.f32 %v2028_v22  ;;  %v1698_v39 = vmul.f32 -1.442695, %v2028_v22 }
 0x5cc   :  { %2092 = vpow2.f32 %v1697_v26 }
 0x5d5   :  { %v2091_v24 = vpop.eup %2090 }
 0x5d6   :  { %528 = vrot.lane.b32.xlu1 %v2091_v24, %s2324_s16  ;;  %v2093_v27 = vpop.eup %2092 }
 0x5d7   :  { %v519_v28 = vadd.f32 1.0, %v2093_v27 }
 0x5d9   :  { %2094 = vrcp.f32 %v519_v28 }
 0x5e3   :  { %v2095_v31 = vpop.eup %2094 }
 0x5e4   :  { %v526_v35 = vmul.f32 %v2095_v31, %v430_v8 }
 0x648   :  { %v529_v32 = vpop.permute.xlu1 %528 }
 0x649   :  { %v531_v33 = vmul.f32 %v2095_v31, %v529_v32 }
 0x64b   :  { %533 = vrot.lane.b32.xlu0 %v531_v33, %s2324_s16 }
 0x6bd   :  { %v534_v36 = vpop.permute.xlu0 %533 }
 0x6be   :  { %v536_v37 = vadd.f32 %v534_v36, %v526_v35 }
 0x6c0   :  { %2096 = vtanh.f32 %v536_v37 }
 0x6c1   :  { %2098 = vpow2.f32 %v1698_v39 }
 0x6ca   :  { %v2097_v38 = vpop.eup %2096 }
 0x6cb   :  { %539 = vrot.lane.b32.xlu1 %v2097_v38, %s2324_s16  ;;  %v2099_v40 = vpop.eup %2098 }
 0x6cc   :  { %v520_v41 = vadd.f32 1.0, %v2099_v40 }
 0x6ce   :  { %2100 = vrcp.f32 %v520_v41 }
 0x6d8   :  { %v2101_v42 = vpop.eup %2100 }
 0x73d   :  { %v540_v43 = vpop.permute.xlu1 %539 }
 0x73e   :  { %v542_v44 = vmul.f32 %v2101_v42, %v540_v43 }
 0x740   :  { %1699 = vmatmul.mubr.msk.f32.vlgmr.msra.gmra.mrb[6].mxu0 %vm332_vm1, %v542_v44 }
 0x741   :  { %1804 = vmatpush1.bf16.msra.mxu0 %v2451_v13  ;;  %718 = vmatprep.mubr.f32.mxu0 %v2323_v0 }
 0x742   :  { %1806 = vmatprep.subr.bf16.mxu0 %v2455_v18 }
 0x745   :  { %1808 = vmatpush1.bf16.msra.mxu0 %v2460_v20 }
 0x746   :  { %1810 = vmatprep.subr.bf16.mxu0 %v2463_v23 }
 0x749   :  { %1812 = vmatpush1.bf16.msra.mxu0 %v2470_v29 }
 0x74a   :  { %1814 = vmatprep.subr.bf16.mxu0 %v2473_v30 }
 0x74d   :  { %1816 = vmatpush1.bf16.msra.mxu0 %v2479_v34 }
 0x74e   :  { %1818 = vmatprep.subr.bf16.mxu0 %v2449_v10 }
 0x813   :  { %v614_v47 = vpop.f32.mrb[6].mxu0 }
 0x814   :  { %v616_v48 = vpop.f32.mrb[7].mxu0  ;;  %v2029_v53 = vadd.f32 %v614_v47, %v2439_v60 }
 0x815   :  { %v2030_v49 = vadd.f32 %v616_v48, %v2428_v54 }
 0x816   :  { %v1700_v55 = vmul.f32 -1.442695, %v2029_v53 }
 0x817   :  { %2102 = vtanh.f32 %v2030_v49  ;;  %v1701_v4 = vmul.f32 -1.442695, %v2030_v49 }
 0x818   :  { %2104 = vpow2.f32 %v1700_v55 }
 0x821   :  { %v2103_v50 = vpop.eup %2102 }
 0x822   :  { %634 = vrot.lane.b32.xlu0 %v2103_v50, %s2324_s16  ;;  %v2105_v56 = vpop.eup %2104 }
 0x823   :  { %v625_v57 = vadd.f32 1.0, %v2105_v56 }
 0x825   :  { %2106 = vrcp.f32 %v625_v57 }
 0x82f   :  { %v2107_v58 = vpop.eup %2106 }
 0x830   :  { %v632_v63 = vmul.f32 %v2107_v58, %v536_v37 }
 0x894   :  { %v635_v61 = vpop.permute.xlu0 %634 }
 0x895   :  { %v637_v62 = vmul.f32 %v2107_v58, %v635_v61 }
 0x897   :  { %639 = vrot.lane.b32.xlu1 %v637_v62, %s2324_s16 }
 0x909   :  { %v640_v1 = vpop.permute.xlu1 %639 }
 0x90a   :  { %v642_v2 = vadd.f32 %v640_v1, %v632_v63 }
 0x90c   :  { %2108 = vtanh.f32 %v642_v2 }
 0x90d   :  { %2110 = vpow2.f32 %v1701_v4 }
 0x916   :  { %v2109_v3 = vpop.eup %2108 }
 0x917   :  { %645 = vrot.lane.b32.xlu0 %v2109_v3, %s2324_s16  ;;  %v2111_v5 = vpop.eup %2110 }
 0x918   :  { %v626_v6 = vadd.f32 1.0, %v2111_v5 }
 0x91a   :  { %2112 = vrcp.f32 %v626_v6 }
 0x924   :  { %v2113_v7 = vpop.eup %2112 }
 0x989   :  { %v646_v8 = vpop.permute.xlu0 %645 }
 0x98a   :  { %v648_v9 = vmul.f32 %v2113_v7, %v646_v8 }
 0x98c   :  { %1702 = vmatmul.mubr.msk.f32.vlgmr.msra.gmra.mrb[8].mxu0 %vm332_vm1, %v648_v9 }
 0x98d   :  { %1820 = vmatpush1.bf16.msra.mxu0 %v2451_v13  ;;  %824 = vmatprep.mubr.f32.mxu0 %v2323_v0 }
 0x98e   :  { %1822 = vmatprep.subr.bf16.mxu0 %v2455_v18 }
 0x991   :  { %1824 = vmatpush1.bf16.msra.mxu0 %v2460_v20 }
 0x992   :  { %1826 = vmatprep.subr.bf16.mxu0 %v2463_v23 }
 0x995   :  { %1828 = vmatpush1.bf16.msra.mxu0 %v2470_v29 }
 0x996   :  { %1830 = vmatprep.subr.bf16.mxu0 %v2473_v30 }
 0x999   :  { %1832 = vmatpush1.bf16.msra.mxu0 %v2479_v34 }
 0x99a   :  { %1834 = vmatprep.subr.bf16.mxu0 %v2449_v10 }
 0xa5f   :  { %v720_v11 = vpop.f32.mrb[8].mxu0 }
 0xa60   :  { %v722_v12 = vpop.f32.mrb[9].mxu0  ;;  %v2031_v16 = vadd.f32 %v720_v11, %v2439_v60 }
 0xa61   :  { %v2032_v14 = vadd.f32 %v722_v12, %v2428_v54 }
 0xa62   :  { %v1703_v17 = vmul.f32 -1.442695, %v2031_v16 }
 0xa63   :  { %2114 = vtanh.f32 %v2032_v14  ;;  %v1704_v32 = vmul.f32 -1.442695, %v2032_v14 }
 0xa64   :  { %2116 = vpow2.f32 %v1703_v17 }
 0xa6d   :  { %v2115_v15 = vpop.eup %2114 }
 0xa6e   :  { %740 = vrot.lane.b32.xlu1 %v2115_v15, %s2324_s16  ;;  %v2117_v19 = vpop.eup %2116 }
 0xa6f   :  { %v731_v21 = vadd.f32 1.0, %v2117_v19 }
 0xa71   :  { %2118 = vrcp.f32 %v731_v21  ;;  %v253_v21 = vadd.f32 %v2496_v46, %v2428_v54 }
 0xa7b   :  { %v2119_v22 = vpop.eup %2118 }
 0xa7c   :  { %v738_v26 = vmul.f32 %v2119_v22, %v642_v2 }
 0xae0   :  { %v741_v24 = vpop.permute.xlu1 %740 }
 0xae1   :  { %v743_v25 = vmul.f32 %v2119_v22, %v741_v24 }
 0xae3   :  { %745 = vrot.lane.b32.xlu0 %v743_v25, %s2324_s16 }
 0xb55   :  { %v746_v27 = vpop.permute.xlu0 %745 }
 0xb56   :  { %v748_v28 = vadd.f32 %v746_v27, %v738_v26  ;;  %v251_v27 = vadd.f32 %v2494_v45, %v2439_v60 }
 0xb58   :  { %2120 = vtanh.f32 %v748_v28 }
 0xb59   :  { %2122 = vpow2.f32 %v1704_v32 }
 0xb62   :  { %v2121_v31 = vpop.eup %2120 }
 0xb63   :  { %751 = vrot.lane.b32.xlu1 %v2121_v31, %s2324_s16  ;;  %v2123_v33 = vpop.eup %2122 }
 0xb64   :  { %v732_v35 = vadd.f32 1.0, %v2123_v33 }
 0xb66   :  { %2124 = vrcp.f32 %v732_v35 }
 0xb70   :  { %v2125_v36 = vpop.eup %2124 }
 0xbd5   :  { %v752_v37 = vpop.permute.xlu1 %751 }
 0xbd6   :  { %v754_v38 = vmul.f32 %v2125_v36, %v752_v37 }
 0xbd8   :  { %1705 = vmatmul.mubr.msk.f32.vlgmr.msra.gmra.mrb[10].mxu0 %vm332_vm1, %v754_v38 }
 0xbd9   :  { %1836 = vmatpush1.bf16.msra.mxu0 %v2451_v13  ;;  %930 = vmatprep.mubr.f32.mxu0 %v2323_v0 }
 0xbda   :  { %1838 = vmatprep.subr.bf16.mxu0 %v2455_v18 }
 0xbdd   :  { %1840 = vmatpush1.bf16.msra.mxu0 %v2460_v20 }
 0xbde   :  { %1842 = vmatprep.subr.bf16.mxu0 %v2463_v23 }
 0xbe1   :  { %1844 = vmatpush1.bf16.msra.mxu0 %v2470_v29 }
 0xbe2   :  { %1846 = vmatprep.subr.bf16.mxu0 %v2473_v30 }
 0xbe5   :  { %1848 = vmatpush1.bf16.msra.mxu0 %v2479_v34 }
 0xbe6   :  { %1850 = vmatprep.subr.bf16.mxu0 %v2449_v10 }
 0xcab   :  { %v826_v39 = vpop.f32.mrb[10].mxu0 }
 0xcac   :  { %v828_v40 = vpop.f32.mrb[11].mxu0  ;;  %v2033_v43 = vadd.f32 %v826_v39, %v2439_v60 }
 0xcad   :  { %v2034_v41 = vadd.f32 %v828_v40, %v2428_v54 }
 0xcae   :  { %v1706_v44 = vmul.f32 -1.442695, %v2033_v43 }
 0xcaf   :  { %2126 = vtanh.f32 %v2034_v41  ;;  %v1707_v58 = vmul.f32 -1.442695, %v2034_v41 }
 0xcb0   :  { %2128 = vpow2.f32 %v1706_v44 }
 0xcb9   :  { %v2127_v42 = vpop.eup %2126 }
 0xcba   :  { %846 = vrot.lane.b32.xlu0 %v2127_v42, %s2324_s16  ;;  %v2129_v47 = vpop.eup %2128 }
 0xcbb   :  { %v837_v48 = vadd.f32 1.0, %v2129_v47 }
 0xcbd   :  { %2130 = vrcp.f32 %v837_v48 }
 0xcc7   :  { %v2131_v49 = vpop.eup %2130 }
 0xcc8   :  { %v844_v10 = vmul.f32 %v2131_v49, %v748_v28 }
 0xd2c   :  { %v847_v50 = vpop.permute.xlu0 %846 }
 0xd2d   :  { %v849_v53 = vmul.f32 %v2131_v49, %v847_v50 }
 0xd2f   :  { %851 = vrot.lane.b32.xlu1 %v849_v53, %s2324_s16 }
 0xda1   :  { %v852_v55 = vpop.permute.xlu1 %851 }
 0xda2   :  { %v854_v56 = vadd.f32 %v852_v55, %v844_v10 }
 0xda4   :  { %2132 = vtanh.f32 %v854_v56 }
 0xda5   :  { %2134 = vpow2.f32 %v1707_v58 }
 0xdae   :  { %v2133_v57 = vpop.eup %2132 }
 0xdaf   :  { %857 = vrot.lane.b32.xlu0 %v2133_v57, %s2324_s16  ;;  %v2135_v61 = vpop.eup %2134 }
 0xdb0   :  { %v838_v62 = vadd.f32 1.0, %v2135_v61 }
 0xdb2   :  { %2136 = vrcp.f32 %v838_v62 }
 0xdbc   :  { %v2137_v63 = vpop.eup %2136 }
 0xe21   :  { %v858_v1 = vpop.permute.xlu0 %857 }
 0xe22   :  { %v860_v2 = vmul.f32 %v2137_v63, %v858_v1 }
 0xe24   :  { %1708 = vmatmul.mubr.msk.f32.vlgmr.msra.gmra.mrb[12].mxu0 %vm332_vm1, %v860_v2 }
 0xe25   :  { %1852 = vmatpush1.bf16.msra.mxu0 %v2451_v13  ;;  %1036 = vmatprep.mubr.f32.mxu0 %v2323_v0 }
 0xe26   :  { %1854 = vmatprep.subr.bf16.mxu0 %v2455_v18 }
 0xe29   :  { %1856 = vmatpush1.bf16.msra.mxu0 %v2460_v20 }
 0xe2a   :  { %1858 = vmatprep.subr.bf16.mxu0 %v2463_v23 }
 0xe2d   :  { %1860 = vmatpush1.bf16.msra.mxu0 %v2470_v29 }
 0xe2e   :  { %1862 = vmatprep.subr.bf16.mxu0 %v2473_v30 }
 0xe31   :  { %1864 = vmatpush1.bf16.msra.mxu0 %v2479_v34 }
 0xef7   :  { %v932_v3 = vpop.f32.mrb[12].mxu0 }
 0xef8   :  { %v934_v4 = vpop.f32.mrb[13].mxu0  ;;  %v2035_v18 = vadd.f32 %v932_v3, %v2439_v60 }
 0xef9   :  { %v2036_v5 = vadd.f32 %v934_v4, %v2428_v54 }
 0xefa   :  { %v1709_v6 = vmul.f32 -1.442695, %v2035_v18 }
 0xefb   :  { %2138 = vtanh.f32 %v2036_v5  ;;  %v1710_v12 = vmul.f32 -1.442695, %v2036_v5 }
 0xefc   :  { %2140 = vpow2.f32 %v1709_v6 }
 0xf05   :  { %v2139_v13 = vpop.eup %2138 }
 0xf06   :  { %952 = vrot.lane.b32.xlu1 %v2139_v13, %s2324_s16  ;;  %v2141_v20 = vpop.eup %2140 }
 0xf07   :  { %v943_v23 = vadd.f32 1.0, %v2141_v20 }
 0xf09   :  { %2142 = vrcp.f32 %v943_v23 }
 0xf13   :  { %v2143_v29 = vpop.eup %2142 }
 0xf14   :  { %v950_v34 = vmul.f32 %v2143_v29, %v854_v56 }
 0xf78   :  { %v953_v7 = vpop.permute.xlu1 %952 }
 0xf79   :  { %v955_v30 = vmul.f32 %v2143_v29, %v953_v7 }
 0xf7b   :  { %957 = vrot.lane.b32.xlu0 %v955_v30, %s2324_s16 }
 0xfed   :  { %v958_v8 = vpop.permute.xlu0 %957 }
 0xfee   :  { %v960_v9 = vadd.f32 %v958_v8, %v950_v34 }
 0xff0   :  { %2144 = vtanh.f32 %v960_v9 }
 0xff1   :  { %2146 = vpow2.f32 %v1710_v12 }
 0xffa   :  { %v2145_v11 = vpop.eup %2144 }
 0xffb   :  { %963 = vrot.lane.b32.xlu1 %v2145_v11, %s2324_s16  ;;  %v2147_v14 = vpop.eup %2146 }
 0xffc   :  { %v944_v15 = vadd.f32 1.0, %v2147_v14 }
 0xffe   :  { %2148 = vrcp.f32 %v944_v15 }
0x1008   :  { %v2149_v16 = vpop.eup %2148 }
0x106d   :  { %v964_v17 = vpop.permute.xlu1 %963 }
0x106e   :  { %v966_v19 = vmul.f32 %v2149_v16, %v964_v17 }
0x1070   :  { %1711 = vmatmul.mubr.msk.f32.vlgmr.msra.gmra.mrb[16].mxu0 %vm332_vm1, %v966_v19 }
0x1143   :  { %v1038_v22 = vpop.f32.mrb[16].mxu0 }
0x1144   :  { %v1040_v24 = vpop.f32.mrb[17].mxu0  ;;  %v1039_v28 = vadd.f32 %v1038_v22, %v251_v27 }
0x1145   :  { %v1041_v25 = vadd.f32 %v1040_v24, %v253_v21 }
0x1146   :  { %v1712_v31 = vmul.f32 -1.442695, %v1039_v28 }
0x1147   :  { %2150 = vtanh.f32 %v1041_v25  ;;  %v1713_v40 = vmul.f32 -1.442695, %v1041_v25 }
0x1148   :  { %2152 = vpow2.f32 %v1712_v31 }
0x1151   :  { %v2151_v26 = vpop.eup %2150 }
0x1152   :  { %1058 = vrot.lane.b32.xlu0 %v2151_v26, %s2324_s16  ;;  %v2153_v32 = vpop.eup %2152 }
0x1153   :  { %v1049_v33 = vadd.f32 1.0, %v2153_v32 }
0x1155   :  { %2154 = vrcp.f32 %v1049_v33 }
0x115f   :  { %v2155_v35 = vpop.eup %2154 }
0x1160   :  { %v1056_v54 = vmul.f32 %v2155_v35, %v960_v9 }
0x11c4   :  { %v1059_v36 = vpop.permute.xlu0 %1058 }
0x11c5   :  { %v1061_v37 = vmul.f32 %v2155_v35, %v1059_v36 }
0x11c7   :  { %1063 = vrot.lane.b32.xlu1 %v1061_v37, %s2324_s16 }
0x1239   :  { %v1064_v46 = vpop.permute.xlu1 %1063 }
0x123a   :  { %v1066_v38 = vadd.f32 %v1064_v46, %v1056_v54 }
0x123c   :  { %2156 = vtanh.f32 %v1066_v38 }
0x123d   :  { %2158 = vpow2.f32 %v1713_v40 }
0x1246   :  { %v2157_v39 = vpop.eup %2156 }
0x1247   :  { %1069 = vrot.lane.b32.xlu0 %v2157_v39, %s2324_s16  ;;  %v2159_v60 = vpop.eup %2158 }
0x1248   :  { %v1050_v45 = vadd.f32 1.0, %v2159_v60 }
0x124a   :  { %2160 = vrcp.f32 %v1050_v45 }
0x1254   :  { %v2161_v41 = vpop.eup %2160 }
0x12b9   :  { %v1070_v42 = vpop.permute.xlu0 %1069 }
0x12ba   :  { %v1072_v43 = vmul.f32 %v2161_v41, %v1070_v42 }
0x12bc   :  { %1714 = vmatmul.mubr.msk.f32.vlgmr.msra.gmra.mrb[0].mxu1 %vm332_vm1, %v1072_v43 }
0x138f   :  { %v1142_v44 = vpop.f32.mrb[0].mxu1 }
0x1390   :  { %v1144_v47 = vpop.f32.mrb[1].mxu1  ;;  %v1143_v50 = vadd.f32 %v1142_v44, %v251_v27 }
0x1391   :  { %v1145_v48 = vadd.f32 %v1144_v47, %v253_v21 }
0x1392   :  { %v1715_v53 = vmul.f32 -1.442695, %v1143_v50 }
0x1393   :  { %2162 = vtanh.f32 %v1145_v48 }
0x1394   :  { %2164 = vpow2.f32 %v1715_v53 }
0x139d   :  { %v2163_v49 = vpop.eup %2162 }
0x139e   :  { %1162 = vrot.lane.b32.xlu1 %v2163_v49, %s2324_s16  ;;  %v2165_v10 = vpop.eup %2164 }
0x139f   :  { %v1153_v55 = vadd.f32 1.0, %v2165_v10 }
0x13a1   :  { %2166 = vrcp.f32 %v1153_v55 }
0x13ab   :  { %v2167_v56 = vpop.eup %2166 }
0x13ac   :  { %v1160_v61 = vmul.f32 %v2167_v56, %v1066_v38 }
0x1410   :  { %v1163_v57 = vpop.permute.xlu1 %1162 }
0x1411   :  { %v1165_v58 = vmul.f32 %v2167_v56, %v1163_v57 }
0x1413   :  { %1167 = vrot.lane.b32.xlu0 %v1165_v58, %s2324_s16 }
0x1485   :  { %v1168_v62 = vpop.permute.xlu0 %1167 }
0x1486   :  { %2249 = shalt.err (!%p2246_p12)  }
0x1487   :  { %s2250_s10 = scalar_lea.vmem %s75_s23, 2048  ;;  %p2255_p0 = scmp.lt.s32.totalorder %s75_s23, %s75_s23 }
0x1488   :  { %p2251_p13 = scmp.ne.s32.totalorder %s75_s23, %s2250_s10  ;;  %p2256_p1 = scmp.lt.s32.totalorder %s2250_s10, %s2250_s10 }
0x148a   :  { %p2257_p2 = por %p2256_p1, %p2255_p0 }
0x148c   :  { %p2258_p3 = pnand %p2257_p2, %p2251_p13 }
0x148e   :  { %2261 = shalt.err (!%p2258_p3)  }
0x148f   :  { %77 = dma.hbm_to_vmem [thread:$0]  %s2669_s4, 2048, %s75_s23, [#allocation5]  ;;  %v1170_v63 = vadd.f32 %v1168_v62, %v1160_v61 }
0x1490   :  { %s2262_s17 = scalar_lea.hbm %s2671_s6, 16384 }
0x1491   :  { %p2263_p4 = scmp.ne.s32.totalorder %s2671_s6, %s2262_s17  ;;  %p2266_p5 = scmp.lt.u32.totalorder %s2262_s17, %s2671_s6 }
0x1493   :  { %p2268_p6 = pnand %p2266_p5, %p2263_p4 }
0x1495   :  { %2271 = shalt.err (!%p2268_p6)  }
0x1496   :  { %s2272_s0 = scalar_lea.vmem %s87_s25, 16384  ;;  %p2277_p8 = scmp.lt.s32.totalorder %s87_s25, %s87_s25 }
0x1497   :  { %p2273_p7 = scmp.ne.s32.totalorder %s87_s25, %s2272_s0  ;;  %p2278_p9 = scmp.lt.s32.totalorder %s2272_s0, %s2272_s0 }
0x1499   :  { %p2279_p10 = por %p2278_p9, %p2277_p8 }
0x149b   :  { %p2280_p11 = pnand %p2279_p10, %p2273_p7 }
0x149d   :  { %2283 = shalt.err (!%p2280_p11)  }
0x149e   :  { %89 = dma.hbm_to_vmem [thread:$0]  %s2671_s6, 16384, %s87_s25, [#allocation5 + $0x1]  ;;  %2168 = vtanh.f32 %v1170_v63  ;;  %v1716_v2 = vmul.f32 -1.442695, %v1145_v48 }
0x14a0   :  { %2170 = vpow2.f32 %v1716_v2 }
0x14a8   :  { %v2169_v1 = vpop.eup %2168 }
0x14a9   :  { %1173 = vrot.lane.b32.xlu1 %v2169_v1, %s2324_s16 }
0x14aa   :  { %v2171_v3 = vpop.eup %2170 }
0x14ab   :  { %v1154_v4 = vadd.f32 1.0, %v2171_v3 }
0x14ad   :  { %2172 = vrcp.f32 %v1154_v4 }
0x14b7   :  { %v2173_v5 = vpop.eup %2172 }
0x151b   :  { %v1174_v13 = vpop.permute.xlu1 %1173 }
0x151c   :  { %v1176_v18 = vmul.f32 %v2173_v5, %v1174_v13 }
0x151d   :  { %2310 = dma.done.wait [#allocation5], 2048 }
0x151e   :  { %2311 = vsyncadd [#allocation5], 4294965248  ;;  %1289 = vmatprep.mubr.f32.mxu1 %v2323_v0  ;;  %s2327_s3 = smov 96   ;;  %v1182_v6 = vld [vmem:[#allocation3 + $0x8] sm:$0xff]  ;;  %v1181_v23 = vld [vmem:[#allocation3] sm:$0xff]  ;;  %vm1222_vm2 = vcmask 261120  }
0x151f   :  { %1220 = vrot.lane.b32.xlu0 %v1176_v18, %s2327_s3  ;;  %v1186_v20 = vld [vmem:[#allocation3 + $0x28] sm:$0xff]  ;;  %v1185_v7 = vld [vmem:[#allocation3 + $0x20] sm:$0xff]  ;;  %v1184_v14 = vld [vmem:[#allocation3 + $0x18] sm:$0xff]  ;;  %v1209_v38 = vsub.s32 2, %v2419_v51 }
0x1520   :  { %v1881_v29 = vpack.c.bf16 %v1186_v20, %v1182_v6  ;;  %v1190_v30 = vld [vmem:[#allocation3 + $0x48] sm:$0xff]  ;;  %v1883_v8 = vpack.c.bf16 %v1185_v7, %v1181_v23  ;;  %v1189_v11 = vld [vmem:[#allocation3 + $0x40] sm:$0xff]  ;;  %v1188_v15 = vld [vmem:[#allocation3 + $0x38] sm:$0xff] }
0x1521   :  { %v1194_v34 = vld [vmem:[#allocation3 + $0x68] sm:$0xff]  ;;  %v1193_v12 = vld [vmem:[#allocation3 + $0x60] sm:$0xff]  ;;  %v1889_v17 = vpack.c.bf16 %v1188_v15, %v1184_v14  ;;  %v1183_v19 = vld [vmem:[#allocation3 + $0x10] sm:$0xff] }
0x1522   :  { %v1885_v9 = vpack.c.bf16 %v1194_v34, %v1190_v30  ;;  %1882 = vmatprep.subr.bf16.mxu1 %v1881_v29  ;;  %v1887_v16 = vpack.c.bf16 %v1193_v12, %v1189_v11  ;;  %v1187_v21 = vld [vmem:[#allocation3 + $0x30] sm:$0xff]  ;;  %v1192_v22 = vld [vmem:[#allocation3 + $0x58] sm:$0xff]  ;;  %v1197_v33 = vld [vmem:[%s2670_s5] sm:$0xf] }
0x1523   :  { %1884 = vmatpush1.bf16.msra.mxu1 %v1883_v8  ;;  %v1196_v24 = vld [vmem:[#allocation3 + $0x78] sm:$0xff]  ;;  %v1891_v25 = vpack.c.bf16 %v1187_v21, %v1183_v19  ;;  %v1191_v27 = vld [vmem:[#allocation3 + $0x50] sm:$0xff]  ;;  %v1202_v35 = vrot.slane %v1197_v33, %v2436_v59  ;;  %v1206_v36 = vrot.slane %v1197_v33, %v2422_v52  ;;  %v1210_v45 = vrot.slane %v1197_v33, %v1209_v38 }
0x1524   :  { %1886 = vmatprep.subr.bf16.mxu1 %v1885_v9  ;;  %v1893_v26 = vpack.c.bf16 %v1196_v24, %v1192_v22  ;;  %v1195_v28 = vld [vmem:[#allocation3 + $0x70] sm:$0xff] }
0x1525   :  { %v1895_v32 = vpack.c.bf16 %v1195_v28, %v1191_v27 }
0x1527   :  { %1888 = vmatpush1.bf16.msra.mxu1 %v1887_v16 }
0x1528   :  { %1890 = vmatprep.subr.bf16.mxu1 %v1889_v17 }
0x1591   :  { %v1221_v31 = vpop.permute.xlu0 %1220 }
0x1592   :  { %1717 = vmatmul.mubr.msk.f32.vlgmr.msra.gmra.mrb[2].mxu1 %vm1222_vm2, %v1221_v31 }
0x1593   :  { %1892 = vmatpush1.bf16.msra.mxu1 %v1891_v25  ;;  %1360 = vmatprep.mubr.f32.mxu1 %v2323_v0  ;;  %v1213_v0 = vsub.s32 3, %v2419_v51 }
0x1594   :  { %1894 = vmatprep.subr.bf16.mxu1 %v1893_v26 }
0x1595   :  { %v1214_v41 = vrot.slane %v1197_v33, %v1213_v0 }
0x1597   :  { %1896 = vmatpush1.bf16.msra.mxu1 %v1895_v32 }
0x159a   :  { %1718 = vmatmul.mubr.msk.f32.vlgmr.msra.gmra.mrb[4].mxu1 %vm1222_vm2, %v1221_v31 }
0x1665   :  { %v1291_v37 = vpop.f32.mrb[2].mxu1 }
0x1666   :  { %v2631_v54 = vadd.f32 %v1291_v37, %v1202_v35  ;;  %v1293_v46 = vpop.f32.mrb[3].mxu1 }
0x1667   :  { %v1294_v39 = vadd.f32 %v1293_v46, %v1206_v36 }
0x1668   :  { %v1367_v40 = vmax.f32 %v2631_v54, 0.0 }
0x1669   :  { %v1368_v60 = vmax.f32 %v1294_v39, 0.0 }
0x166d   :  { %v1362_v42 = vpop.f32.mrb[4].mxu1 }
0x166e   :  { %v2636_v43 = vadd.f32 %v1362_v42, %v1210_v45  ;;  %v1364_v44 = vpop.f32.mrb[5].mxu1 }
0x166f   :  { %v2638_v47 = vadd.f32 %v1364_v44, %v1214_v41 }
0x1670   :  { %v1369_v48 = vmax.f32 %v2636_v43, 0.0 }
0x1671   :  { %v1370_v49 = vmax.f32 %v2638_v47, 0.0 }
0x1672   :  { %2312 = dma.done.wait [#allocation5 + $0x1], 16384 }
0x1673   :  { %2313 = vsyncadd [#allocation5 + $0x1], 4294950912  ;;  %1579 = vmatprep.mubr.f32.mxu1 %v1368_v60  ;;  %v1376_v50 = vld [vmem:[#allocation4 + $0x8] sm:$0xff]  ;;  %v1378_v51 = vld [vmem:[#allocation4 + $0x18] sm:$0xff]  ;;  %s2328_s2 = smov [#allocation12]  }
0x1674   :  { %v1375_v53 = vld [vmem:[#allocation4] sm:$0xff]  ;;  %v1897_v10 = vpack.c.bf16 %v1378_v51, %v1376_v50  ;;  %v1377_v55 = vld [vmem:[#allocation4 + $0x10] sm:$0xff]  ;;  %v1380_v56 = vld [vmem:[#allocation4 + $0x28] sm:$0xff]  ;;  %s1667_s23 = sshll.u32 %s2328_s2, 4  ;;  %s1668_s23 = int_to_ptr.vmem [resolvable:$true] %s1667_s23 }
0x1675   :  { %v1382_v57 = vld [vmem:[#allocation4 + $0x38] sm:$0xff]  ;;  %v1899_v58 = vpack.c.bf16 %v1377_v55, %v1375_v53  ;;  %v1379_v62 = vld [vmem:[#allocation4 + $0x20] sm:$0xff]  ;;  %v1381_v63 = vld [vmem:[#allocation4 + $0x30] sm:$0xff]  ;;  %s2284_s24 = scalar_lea.vmem %s1668_s23, 256  ;;  %p2289_p13 = scmp.lt.s32.totalorder %s1668_s23, %s1668_s23 }
0x1676   :  { %v1901_v61 = vpack.c.bf16 %v1382_v57, %v1380_v56  ;;  %v1384_v1 = vld [vmem:[#allocation4 + $0x48] sm:$0xff]  ;;  %1898 = vmatprep.subr.bf16.mxu1 %v1897_v10  ;;  %v1386_v2 = vld [vmem:[#allocation4 + $0x58] sm:$0xff]  ;;  %v1903_v3 = vpack.c.bf16 %v1381_v63, %v1379_v62  ;;  %v1383_v5 = vld [vmem:[#allocation4 + $0x40] sm:$0xff]  ;;  %p2285_p12 = scmp.ne.s32.totalorder %s1668_s23, %s2284_s24  ;;  %p2290_p0 = scmp.lt.s32.totalorder %s2284_s24, %s2284_s24 }
0x1677   :  { %1900 = vmatpush1.bf16.msra.mxu1 %v1899_v58  ;;  %v1905_v4 = vpack.c.bf16 %v1386_v2, %v1384_v1  ;;  %v1385_v13 = vld [vmem:[#allocation4 + $0x50] sm:$0xff]  ;;  %v1388_v18 = vld [vmem:[#allocation4 + $0x68] sm:$0xff]  ;;  %v1390_v6 = vld [vmem:[#allocation4 + $0x78] sm:$0xff] }
0x1678   :  { %1902 = vmatprep.subr.bf16.mxu1 %v1901_v61  ;;  %v1907_v20 = vpack.c.bf16 %v1385_v13, %v1383_v5  ;;  %v1909_v23 = vpack.c.bf16 %v1390_v6, %v1388_v18  ;;  %v1387_v29 = vld [vmem:[#allocation4 + $0x60] sm:$0xff]  ;;  %v1389_v7 = vld [vmem:[#allocation4 + $0x70] sm:$0xff]  ;;  %v1392_v30 = vld [vmem:[#allocation4 + $0x88] sm:$0xff]  ;;  %p2291_p1 = por %p2290_p0, %p2289_p13 }
0x1679   :  { %v1394_v34 = vld [vmem:[#allocation4 + $0x98] sm:$0xff]  ;;  %v1911_v8 = vpack.c.bf16 %v1389_v7, %v1387_v29  ;;  %v1391_v11 = vld [vmem:[#allocation4 + $0x80] sm:$0xff]  ;;  %v1393_v12 = vld [vmem:[#allocation4 + $0x90] sm:$0xff] }
0x167a   :  { %v1913_v9 = vpack.c.bf16 %v1394_v34, %v1392_v30  ;;  %v1396_v14 = vld [vmem:[#allocation4 + $0xa8] sm:$0xff]  ;;  %v1398_v15 = vld [vmem:[#allocation4 + $0xb8] sm:$0xff]  ;;  %v1915_v16 = vpack.c.bf16 %v1393_v12, %v1391_v11  ;;  %v1395_v19 = vld [vmem:[#allocation4 + $0xa0] sm:$0xff]  ;;  %p2292_p2 = pnand %p2291_p1, %p2285_p12 }
0x167b   :  { %1904 = vmatpush1.bf16.msra.mxu1 %v1903_v3  ;;  %v1917_v17 = vpack.c.bf16 %v1398_v15, %v1396_v14  ;;  %v1397_v21 = vld [vmem:[#allocation4 + $0xb0] sm:$0xff]  ;;  %v1400_v22 = vld [vmem:[#allocation4 + $0xc8] sm:$0xff]  ;;  %v1402_v24 = vld [vmem:[#allocation4 + $0xd8] sm:$0xff] }
0x167c   :  { %1906 = vmatprep.subr.bf16.mxu1 %v1905_v4  ;;  %v1919_v25 = vpack.c.bf16 %v1397_v21, %v1395_v19  ;;  %v1921_v26 = vpack.c.bf16 %v1402_v24, %v1400_v22  ;;  %v1399_v27 = vld [vmem:[#allocation4 + $0xc0] sm:$0xff]  ;;  %v1401_v28 = vld [vmem:[#allocation4 + $0xd0] sm:$0xff]  ;;  %v1404_v31 = vld [vmem:[#allocation4 + $0xe8] sm:$0xff] }
0x167d   :  { %v1406_v32 = vld [vmem:[#allocation4 + $0xf8] sm:$0xff]  ;;  %v1923_v33 = vpack.c.bf16 %v1401_v28, %v1399_v27  ;;  %v1403_v36 = vld [vmem:[#allocation4 + $0xe0] sm:$0xff]  ;;  %v1405_v37 = vld [vmem:[#allocation4 + $0xf0] sm:$0xff] }
0x167e   :  { %v1925_v35 = vpack.c.bf16 %v1406_v32, %v1404_v31  ;;  %v1408_v46 = vld [vmem:[#allocation4 + $0x108] sm:$0xff]  ;;  %v1410_v38 = vld [vmem:[#allocation4 + $0x118] sm:$0xff]  ;;  %v1927_v39 = vpack.c.bf16 %v1405_v37, %v1403_v36  ;;  %v1407_v60 = vld [vmem:[#allocation4 + $0x100] sm:$0xff] }
0x167f   :  { %1908 = vmatpush1.bf16.msra.mxu1 %v1907_v20  ;;  %v1929_v0 = vpack.c.bf16 %v1410_v38, %v1408_v46  ;;  %v1409_v45 = vld [vmem:[#allocation4 + $0x110] sm:$0xff]  ;;  %v1412_v41 = vld [vmem:[#allocation4 + $0x128] sm:$0xff]  ;;  %v1414_v42 = vld [vmem:[#allocation4 + $0x138] sm:$0xff] }
0x1680   :  { %1910 = vmatprep.subr.bf16.mxu1 %v1909_v23  ;;  %v1931_v44 = vpack.c.bf16 %v1409_v45, %v1407_v60  ;;  %v1933_v50 = vpack.c.bf16 %v1414_v42, %v1412_v41  ;;  %v1411_v51 = vld [vmem:[#allocation4 + $0x120] sm:$0xff]  ;;  %v1413_v53 = vld [vmem:[#allocation4 + $0x130] sm:$0xff]  ;;  %v1416_v10 = vld [vmem:[#allocation4 + $0x148] sm:$0xff] }
0x1681   :  { %v1418_v55 = vld [vmem:[#allocation4 + $0x158] sm:$0xff]  ;;  %v1935_v56 = vpack.c.bf16 %v1413_v53, %v1411_v51  ;;  %v1415_v58 = vld [vmem:[#allocation4 + $0x140] sm:$0xff]  ;;  %v1417_v61 = vld [vmem:[#allocation4 + $0x150] sm:$0xff] }
0x1682   :  { %v1937_v57 = vpack.c.bf16 %v1418_v55, %v1416_v10  ;;  %v1420_v62 = vld [vmem:[#allocation4 + $0x168] sm:$0xff]  ;;  %v1422_v63 = vld [vmem:[#allocation4 + $0x178] sm:$0xff]  ;;  %v1939_v1 = vpack.c.bf16 %v1417_v61, %v1415_v58  ;;  %v1419_v3 = vld [vmem:[#allocation4 + $0x160] sm:$0xff] }
0x1683   :  { %1912 = vmatpush1.bf16.msra.mxu1 %v1911_v8  ;;  %v1941_v2 = vpack.c.bf16 %v1422_v63, %v1420_v62  ;;  %v1421_v4 = vld [vmem:[#allocation4 + $0x170] sm:$0xff]  ;;  %v1424_v5 = vld [vmem:[#allocation4 + $0x188] sm:$0xff]  ;;  %v1426_v13 = vld [vmem:[#allocation4 + $0x198] sm:$0xff] }
0x1684   :  { %1914 = vmatprep.subr.bf16.mxu1 %v1913_v9  ;;  %v1943_v18 = vpack.c.bf16 %v1421_v4, %v1419_v3  ;;  %v1945_v6 = vpack.c.bf16 %v1426_v13, %v1424_v5  ;;  %v1423_v20 = vld [vmem:[#allocation4 + $0x180] sm:$0xff]  ;;  %v1425_v23 = vld [vmem:[#allocation4 + $0x190] sm:$0xff]  ;;  %v1428_v29 = vld [vmem:[#allocation4 + $0x1a8] sm:$0xff] }
0x1685   :  { %v1430_v7 = vld [vmem:[#allocation4 + $0x1b8] sm:$0xff]  ;;  %v1947_v30 = vpack.c.bf16 %v1425_v23, %v1423_v20  ;;  %v1427_v8 = vld [vmem:[#allocation4 + $0x1a0] sm:$0xff]  ;;  %v1429_v9 = vld [vmem:[#allocation4 + $0x1b0] sm:$0xff] }
0x1686   :  { %v1949_v34 = vpack.c.bf16 %v1430_v7, %v1428_v29  ;;  %v1432_v11 = vld [vmem:[#allocation4 + $0x1c8] sm:$0xff]  ;;  %v1434_v12 = vld [vmem:[#allocation4 + $0x1d8] sm:$0xff]  ;;  %v1951_v14 = vpack.c.bf16 %v1429_v9, %v1427_v8  ;;  %v1455_v47 = vld [vmem:[#allocation4 + $0x280] sm:$0xff] }
0x1687   :  { %1916 = vmatpush1.bf16.msra.mxu1 %v1915_v16  ;;  %v1953_v15 = vpack.c.bf16 %v1434_v12, %v1432_v11  ;;  %v1431_v16 = vld [vmem:[#allocation4 + $0x1c0] sm:$0xff]  ;;  %v1436_v19 = vld [vmem:[#allocation4 + $0x1e8] sm:$0xff]  ;;  %v1438_v21 = vld [vmem:[#allocation4 + $0x1f8] sm:$0xff] }
0x1688   :  { %1918 = vmatprep.subr.bf16.mxu1 %v1917_v17  ;;  %v1433_v17 = vld [vmem:[#allocation4 + $0x1d0] sm:$0xff]  ;;  %v1957_v24 = vpack.c.bf16 %v1438_v21, %v1436_v19  ;;  %v1440_v27 = vld [vmem:[#allocation4 + $0x208] sm:$0xff]  ;;  %v1442_v28 = vld [vmem:[#allocation4 + $0x218] sm:$0xff] }
0x1689   :  { %v1955_v22 = vpack.c.bf16 %v1433_v17, %v1431_v16  ;;  %v1961_v32 = vpack.c.bf16 %v1442_v28, %v1440_v27  ;;  %v1444_v36 = vld [vmem:[#allocation4 + $0x228] sm:$0xff]  ;;  %v1446_v37 = vld [vmem:[#allocation4 + $0x238] sm:$0xff]  ;;  %v1459_v3 = vld [vmem:[#allocation4 + $0x2a0] sm:$0xff] }
0x168a   :  { %v1965_v38 = vpack.c.bf16 %v1446_v37, %v1444_v36  ;;  %v1448_v60 = vld [vmem:[#allocation4 + $0x248] sm:$0xff]  ;;  %v1450_v45 = vld [vmem:[#allocation4 + $0x258] sm:$0xff]  ;;  %v1461_v4 = vld [vmem:[#allocation4 + $0x2b0] sm:$0xff] }
0x168b   :  { %1920 = vmatpush1.bf16.msra.mxu1 %v1919_v25  ;;  %v1435_v25 = vld [vmem:[#allocation4 + $0x1e0] sm:$0xff]  ;;  %v1969_v42 = vpack.c.bf16 %v1450_v45, %v1448_v60  ;;  %v1452_v51 = vld [vmem:[#allocation4 + $0x268] sm:$0xff]  ;;  %v1454_v53 = vld [vmem:[#allocation4 + $0x278] sm:$0xff] }
0x168c   :  { %1922 = vmatprep.subr.bf16.mxu1 %v1921_v26  ;;  %v1437_v26 = vld [vmem:[#allocation4 + $0x1f0] sm:$0xff]  ;;  %v1973_v55 = vpack.c.bf16 %v1454_v53, %v1452_v51  ;;  %v1456_v58 = vld [vmem:[#allocation4 + $0x288] sm:$0xff]  ;;  %v1458_v54 = vld [vmem:[#allocation4 + $0x298] sm:$0xff] }
0x168d   :  { %v1959_v31 = vpack.c.bf16 %v1437_v26, %v1435_v25  ;;  %v1977_v61 = vpack.c.bf16 %v1458_v54, %v1456_v58  ;;  %v1460_v62 = vld [vmem:[#allocation4 + $0x2a8] sm:$0xff]  ;;  %v1462_v63 = vld [vmem:[#allocation4 + $0x2b8] sm:$0xff]  ;;  %v1463_v20 = vld [vmem:[#allocation4 + $0x2c0] sm:$0xff] }
0x168e   :  { %v1464_v5 = vld [vmem:[#allocation4 + $0x2c8] sm:$0xff]  ;;  %v1466_v13 = vld [vmem:[#allocation4 + $0x2d8] sm:$0xff]  ;;  %v1465_v23 = vld [vmem:[#allocation4 + $0x2d0] sm:$0xff] }
0x168f   :  { %1924 = vmatpush1.bf16.msra.mxu1 %v1923_v33  ;;  %v1439_v33 = vld [vmem:[#allocation4 + $0x200] sm:$0xff]  ;;  %v1468_v29 = vld [vmem:[#allocation4 + $0x2e8] sm:$0xff]  ;;  %v1470_v7 = vld [vmem:[#allocation4 + $0x2f8] sm:$0xff] }
0x1690   :  { %1926 = vmatprep.subr.bf16.mxu1 %v1925_v35  ;;  %v1441_v35 = vld [vmem:[#allocation4 + $0x210] sm:$0xff]  ;;  %v1467_v8 = vld [vmem:[#allocation4 + $0x2e0] sm:$0xff]  ;;  %v1472_v11 = vld [vmem:[#allocation4 + $0x308] sm:$0xff] }
0x1691   :  { %v1963_v46 = vpack.c.bf16 %v1441_v35, %v1439_v33  ;;  %v1469_v9 = vld [vmem:[#allocation4 + $0x2f0] sm:$0xff]  ;;  %v1474_v12 = vld [vmem:[#allocation4 + $0x318] sm:$0xff]  ;;  %v1471_v16 = vld [vmem:[#allocation4 + $0x300] sm:$0xff] }
0x1692   :  { %v1473_v17 = vld [vmem:[#allocation4 + $0x310] sm:$0xff]  ;;  %v1476_v19 = vld [vmem:[#allocation4 + $0x328] sm:$0xff]  ;;  %v1478_v21 = vld [vmem:[#allocation4 + $0x338] sm:$0xff] }
0x1693   :  { %1928 = vmatpush1.bf16.msra.mxu1 %v1927_v39  ;;  %v1443_v39 = vld [vmem:[#allocation4 + $0x220] sm:$0xff]  ;;  %v1477_v26 = vld [vmem:[#allocation4 + $0x330] sm:$0xff]  ;;  %v1480_v27 = vld [vmem:[#allocation4 + $0x348] sm:$0xff] }
0x1694   :  { %1930 = vmatprep.subr.bf16.mxu1 %v1929_v0  ;;  %v1445_v0 = vld [vmem:[#allocation4 + $0x230] sm:$0xff]  ;;  %v1475_v25 = vld [vmem:[#allocation4 + $0x320] sm:$0xff]  ;;  %v1482_v28 = vld [vmem:[#allocation4 + $0x358] sm:$0xff] }
0x1695   :  { %v1967_v41 = vpack.c.bf16 %v1445_v0, %v1443_v39  ;;  %v1479_v33 = vld [vmem:[#allocation4 + $0x340] sm:$0xff]  ;;  %v1481_v35 = vld [vmem:[#allocation4 + $0x350] sm:$0xff]  ;;  %v1484_v36 = vld [vmem:[#allocation4 + $0x368] sm:$0xff] }
0x1696   :  { %v1486_v37 = vld [vmem:[#allocation4 + $0x378] sm:$0xff]  ;;  %v1483_v39 = vld [vmem:[#allocation4 + $0x360] sm:$0xff]  ;;  %v1485_v0 = vld [vmem:[#allocation4 + $0x370] sm:$0xff] }
0x1697   :  { %1932 = vmatpush1.bf16.msra.mxu1 %v1931_v44  ;;  %v1447_v44 = vld [vmem:[#allocation4 + $0x240] sm:$0xff]  ;;  %v1488_v60 = vld [vmem:[#allocation4 + $0x388] sm:$0xff]  ;;  %v1490_v45 = vld [vmem:[#allocation4 + $0x398] sm:$0xff] }
0x1698   :  { %1934 = vmatprep.subr.bf16.mxu1 %v1933_v50  ;;  %v1449_v50 = vld [vmem:[#allocation4 + $0x250] sm:$0xff]  ;;  %v1492_v51 = vld [vmem:[#allocation4 + $0x3a8] sm:$0xff]  ;;  %v1494_v53 = vld [vmem:[#allocation4 + $0x3b8] sm:$0xff] }
0x1699   :  { %v1971_v10 = vpack.c.bf16 %v1449_v50, %v1447_v44  ;;  %v1487_v44 = vld [vmem:[#allocation4 + $0x380] sm:$0xff]  ;;  %v1489_v50 = vld [vmem:[#allocation4 + $0x390] sm:$0xff]  ;;  %v1496_v58 = vld [vmem:[#allocation4 + $0x3c8] sm:$0xff] }
0x169a   :  { %v1498_v54 = vld [vmem:[#allocation4 + $0x3d8] sm:$0xff] }
0x169b   :  { %1936 = vmatpush1.bf16.msra.mxu1 %v1935_v56  ;;  %v1451_v56 = vld [vmem:[#allocation4 + $0x260] sm:$0xff] }
0x169c   :  { %1938 = vmatprep.subr.bf16.mxu1 %v1937_v57  ;;  %v1453_v57 = vld [vmem:[#allocation4 + $0x270] sm:$0xff] }
0x169f   :  { %1940 = vmatpush1.bf16.msra.mxu1 %v1939_v1 }
0x16a0   :  { %1942 = vmatprep.subr.bf16.mxu1 %v1941_v2  ;;  %v1981_v2 = vpack.c.bf16 %v1462_v63, %v1460_v62  ;;  %v1500_v62 = vld [vmem:[#allocation4 + $0x3e8] sm:$0xff]  ;;  %v1502_v63 = vld [vmem:[#allocation4 + $0x3f8] sm:$0xff] }
0x16a3   :  { %1944 = vmatpush1.bf16.msra.mxu1 %v1943_v18  ;;  %v1983_v18 = vpack.c.bf16 %v1461_v4, %v1459_v3  ;;  %v1499_v3 = vld [vmem:[#allocation4 + $0x3e0] sm:$0xff]  ;;  %v1501_v4 = vld [vmem:[#allocation4 + $0x3f0] sm:$0xff] }
0x16a4   :  { %1946 = vmatprep.subr.bf16.mxu1 %v1945_v6  ;;  %v1985_v6 = vpack.c.bf16 %v1466_v13, %v1464_v5  ;;  %v2023_v5 = vpack.c.bf16 %v1501_v4, %v1499_v3  ;;  %v1503_v13 = vld [vmem:[%s2672_s7] sm:$0x3] }
0x16a7   :  { %1948 = vmatpush1.bf16.msra.mxu1 %v1947_v30  ;;  %v1987_v30 = vpack.c.bf16 %v1465_v23, %v1463_v20 }
0x16a8   :  { %1950 = vmatprep.subr.bf16.mxu1 %v1949_v34  ;;  %v1989_v34 = vpack.c.bf16 %v1470_v7, %v1468_v29 }
0x16ab   :  { %1952 = vmatpush1.bf16.msra.mxu1 %v1951_v14  ;;  %v1991_v14 = vpack.c.bf16 %v1469_v9, %v1467_v8 }
0x16ac   :  { %1954 = vmatprep.subr.bf16.mxu1 %v1953_v15  ;;  %v1993_v15 = vpack.c.bf16 %v1474_v12, %v1472_v11 }
0x16af   :  { %1956 = vmatpush1.bf16.msra.mxu1 %v1955_v22  ;;  %v1995_v22 = vpack.c.bf16 %v1473_v17, %v1471_v16 }
0x16b0   :  { %1958 = vmatprep.subr.bf16.mxu1 %v1957_v24  ;;  %v1997_v24 = vpack.c.bf16 %v1478_v21, %v1476_v19 }
0x16b3   :  { %1960 = vmatpush1.bf16.msra.mxu1 %v1959_v31  ;;  %v1999_v31 = vpack.c.bf16 %v1477_v26, %v1475_v25 }
0x16b4   :  { %1962 = vmatprep.subr.bf16.mxu1 %v1961_v32  ;;  %v2001_v32 = vpack.c.bf16 %v1482_v28, %v1480_v27 }
0x16b6   :  { %1580 = vmatmul.mubr.f32.vlgmr.msra.gmra.mrb[6].mxu1 %v1367_v40  ;;  %v1975_v40 = vpack.c.bf16 %v1453_v57, %v1451_v56  ;;  %v1491_v56 = vld [vmem:[#allocation4 + $0x3a0] sm:$0xff]  ;;  %v1493_v57 = vld [vmem:[#allocation4 + $0x3b0] sm:$0xff] }
0x16b7   :  { %1964 = vmatpush1.bf16.msra.mxu1 %v1963_v46  ;;  %1650 = vmatprep.mubr.f32.mxu1 %v1370_v49  ;;  %v1457_v49 = vld [vmem:[#allocation4 + $0x290] sm:$0xff]  ;;  %v2003_v46 = vpack.c.bf16 %v1481_v35, %v1479_v33 }
0x16b8   :  { %1966 = vmatprep.subr.bf16.mxu1 %v1965_v38  ;;  %v1979_v1 = vpack.c.bf16 %v1457_v49, %v1455_v47  ;;  %v2005_v38 = vpack.c.bf16 %v1486_v37, %v1484_v36  ;;  %v1495_v47 = vld [vmem:[#allocation4 + $0x3c0] sm:$0xff]  ;;  %v1497_v49 = vld [vmem:[#allocation4 + $0x3d0] sm:$0xff] }
0x16bb   :  { %1968 = vmatpush1.bf16.msra.mxu1 %v1967_v41  ;;  %v2007_v41 = vpack.c.bf16 %v1485_v0, %v1483_v39 }
0x16bc   :  { %1970 = vmatprep.subr.bf16.mxu1 %v1969_v42  ;;  %v2009_v42 = vpack.c.bf16 %v1490_v45, %v1488_v60 }
0x16bf   :  { %1972 = vmatpush1.bf16.msra.mxu1 %v1971_v10  ;;  %v2011_v10 = vpack.c.bf16 %v1489_v50, %v1487_v44 }
0x16c0   :  { %1974 = vmatprep.subr.bf16.mxu1 %v1973_v55  ;;  %v2013_v55 = vpack.c.bf16 %v1494_v53, %v1492_v51 }
0x16c3   :  { %1976 = vmatpush1.bf16.msra.mxu1 %v1975_v40  ;;  %v2015_v40 = vpack.c.bf16 %v1493_v57, %v1491_v56 }
0x16c4   :  { %1978 = vmatprep.subr.bf16.mxu1 %v1977_v61  ;;  %v2017_v61 = vpack.c.bf16 %v1498_v54, %v1496_v58 }
0x16c7   :  { %1980 = vmatpush1.bf16.msra.mxu1 %v1979_v1  ;;  %v2019_v1 = vpack.c.bf16 %v1497_v49, %v1495_v47 }
0x16c8   :  { %1982 = vmatprep.subr.bf16.mxu1 %v1981_v2  ;;  %v2021_v2 = vpack.c.bf16 %v1502_v63, %v1500_v62 }
0x16cb   :  { %1984 = vmatpush1.bf16.msra.mxu1 %v1983_v18  ;;  %v1508_v18 = vrot.slane %v1503_v13, %v2436_v59 }
0x16cc   :  { %1986 = vmatprep.subr.bf16.mxu1 %v1985_v6  ;;  %v1512_v6 = vrot.slane %v1503_v13, %v2422_v52 }
0x16cf   :  { %1988 = vmatpush1.bf16.msra.mxu1 %v1987_v30 }
0x16d0   :  { %1990 = vmatprep.subr.bf16.mxu1 %v1989_v34 }
0x16d3   :  { %1992 = vmatpush1.bf16.msra.mxu1 %v1991_v14 }
0x16d4   :  { %1994 = vmatprep.subr.bf16.mxu1 %v1993_v15 }
0x16d7   :  { %1996 = vmatpush1.bf16.msra.mxu1 %v1995_v22 }
0x16d8   :  { %1998 = vmatprep.subr.bf16.mxu1 %v1997_v24 }
0x16db   :  { %2000 = vmatpush1.bf16.msra.mxu1 %v1999_v31 }
0x16dc   :  { %2002 = vmatprep.subr.bf16.mxu1 %v2001_v32 }
0x16df   :  { %2004 = vmatpush1.bf16.msra.mxu1 %v2003_v46 }
0x16e0   :  { %2006 = vmatprep.subr.bf16.mxu1 %v2005_v38 }
0x16e3   :  { %2008 = vmatpush1.bf16.msra.mxu1 %v2007_v41 }
0x16e4   :  { %2010 = vmatprep.subr.bf16.mxu1 %v2009_v42 }
0x16e7   :  { %2012 = vmatpush1.bf16.msra.mxu1 %v2011_v10 }
0x16e8   :  { %2014 = vmatprep.subr.bf16.mxu1 %v2013_v55 }
0x16eb   :  { %2016 = vmatpush1.bf16.msra.mxu1 %v2015_v40 }
0x16ec   :  { %2018 = vmatprep.subr.bf16.mxu1 %v2017_v61 }
0x16ef   :  { %2020 = vmatpush1.bf16.msra.mxu1 %v2019_v1 }
0x16f0   :  { %2022 = vmatprep.subr.bf16.mxu1 %v2021_v2 }
0x16f3   :  { %2024 = vmatpush1.bf16.msra.mxu1 %v2023_v5 }
0x16f6   :  { %1651 = vmatmul.mubr.f32.vlgmr.msra.gmra.mrb[6].mxu1 %v1369_v48 }
0x17c9   :  { %v1652_v20 = vpop.f32.mrb[6].mxu1 }
0x17ca   :  { %v2037_v23 = vadd.f32 %v1652_v20, %v1508_v18  ;;  %v1654_v29 = vpop.f32.mrb[7].mxu1 }
0x17cb   :  { %v2038_v7 = vadd.f32 %v1654_v29, %v1512_v6 }
0x17cc   :  { %v1657_v30 = vmax.f32 %v2037_v23, 0.0 }
0x17cd   :  { %v1658_v34 = vmax.f32 %v2038_v7, 0.0 }
0x17ce   :  { %1659 = vst [vmem:[#allocation12] sm:$0xff] %v1657_v30 }
0x17cf   :  { %1660 = vst [vmem:[#allocation12 + $0x8] sm:$0xff] %v1658_v34 }
0x17d0   :  { %2295 = shalt.err (!%p2292_p2)
}
0x17d1   :  { %s2296_s26 = scalar_lea.hbm %s2673_s8, 256 }
0x17d2   :  { %p2297_p3 = scmp.ne.s32.totalorder %s2673_s8, %s2296_s26  ;;  %p2300_p4 = scmp.lt.u32.totalorder %s2296_s26, %s2673_s8 }
0x17d4   :  { %p2302_p5 = pnand %p2300_p4, %p2297_p3 }
0x17d6   :  { %2305 = shalt.err (!%p2302_p5)
}
0x17d7   :  { %1670 = dma.vmem_to_hbm [thread:$0]  %s1668_s23, 256, %s2673_s8, [#allocation8]  }
0x17d8   :  { %2314 = dma.done.wait [#allocation8], 256  }
0x17d9   :  { %2315 = vsyncadd [#allocation8], 4294967040 }
0x17da   :  { %1674 = vsyncpa [#allocation7], 1 }
0x17db   :  { %1675 = vsyncpa [#allocation10], 1 }
0x17dc   :  { %1676 = vsyncpa [#allocation8], 1 }
0x17dd   :  { %1677 = vsyncmov [#allocation5] }
0x17e0   :  { %s1678_s10 = vpop.sfrf %1677 }
0x17e1   :  { %p1719_p6 = scmp.ne.s32.totalorder %s1678_s10, 0 }
0x17e3   :  { %1682 = shalt.err (%p1719_p6)  }
0x17e4   :  { %1684 = vsyncmov [#allocation5 + $0x1] }
0x17e7   :  { %s1685_s11 = vpop.sfrf %1684 }
0x17e8   :  { %p1720_p7 = scmp.ne.s32.totalorder %s1685_s11, 0 }
0x17ea   :  { %1689 = shalt.err (%p1720_p7)  }

</bundles_post_ra>
